<compile_context>
chip_gen: v7x
topology: tpu7x:2x2x1
jax: 0.10.0
libtpu: 0.0.40
codegen_flags: <defaults>
</compile_context>

<pallas_src>
import functools

import jax
import jax.numpy as jnp
import numpy as np
from jax.experimental import pallas as pl
from jax.experimental.pallas import tpu as pltpu

EPS = 1e-5        # nn.BatchNorm2d default eps
LANE = 128        # TPU lane width
VMEM_LIMIT = 64 * 1024 * 1024


def _round_up(x, m):
    return (x + m - 1) // m * m


# --------------------------- Pallas kernels ----------------------------------
def conv_stats_kernel(cols_ref, w_ref, z_ref, sum_ref, ssq_ref):
    """Per M-tile: z = cols @ w (bf16 in, f32 acc); accumulate channel sum/sumsq.

    cols_ref: (TM, K) bf16     w_ref: (K, Cpad) bf16
    z_ref:    (TM, Cpad) f32   sum_ref/ssq_ref: (1, Cpad) f32 resident accumulators
    """
    @pl.when(pl.program_id(0) == 0)
    def _init():
        sum_ref[...] = jnp.zeros_like(sum_ref)
        ssq_ref[...] = jnp.zeros_like(ssq_ref)

    z = jnp.dot(cols_ref[...], w_ref[...], preferred_element_type=jnp.float32)
    z_ref[...] = z
    # One-pass statistics: E[x] and E[x^2] accumulated across M tiles (f32).
    sum_ref[...] += jnp.sum(z, axis=0, keepdims=True)
    ssq_ref[...] += jnp.sum(z * z, axis=0, keepdims=True)


def bn_relu_kernel(z_ref, scale_ref, shift_ref, o_ref):
    """Per M-tile: folded BN affine + ReLU, all in f32."""
    y = z_ref[...] * scale_ref[...] + shift_ref[...]
    o_ref[...] = jnp.maximum(y, 0.0).astype(o_ref.dtype)


# --------------------------- per-layer wrapper --------------------------------
def conv_bn_relu(cols, w_pad, gamma_pad, beta_pad, m_real, *, tm):
    """cols: (M_pad, K) bf16 (zero rows past m_real), w_pad: (K, Cpad) bf16.

    Returns (M_pad, Cpad) f32 = relu(batchnorm(cols @ w_pad)).
    """
    m_pad, k = cols.shape
    c_pad = w_pad.shape[1]
    n_m = m_pad // tm

    flops = 2 * m_pad * k * c_pad
    bytes_accessed = (cols.size * 2) + (w_pad.size * 2) + (m_pad * c_pad * 4)

    # Pass 1: conv-as-matmul + per-channel sum / sum-of-squares accumulators.
    z, csum, cssq = pl.pallas_call(
        conv_stats_kernel,
        out_shape=(
            jax.ShapeDtypeStruct((m_pad, c_pad), jnp.float32),
            jax.ShapeDtypeStruct((1, c_pad), jnp.float32),
            jax.ShapeDtypeStruct((1, c_pad), jnp.float32),
        ),
        grid_spec=pltpu.PrefetchScalarGridSpec(
            num_scalar_prefetch=0,
            grid=(n_m,),
            in_specs=[
                pl.BlockSpec((tm, k), lambda m: (m, 0)),
                pl.BlockSpec((k, c_pad), lambda m: (0, 0)),
            ],
            out_specs=(
                pl.BlockSpec((tm, c_pad), lambda m: (m, 0)),
                pl.BlockSpec((1, c_pad), lambda m: (0, 0)),   # resident accumulator
                pl.BlockSpec((1, c_pad), lambda m: (0, 0)),   # resident accumulator
            ),
        ),
        compiler_params=pltpu.CompilerParams(
            dimension_semantics=("arbitrary",),   # reduction axis (stats accumulators)
            vmem_limit_bytes=VMEM_LIMIT,
        ),
        cost_estimate=pl.CostEstimate(
            flops=flops, transcendentals=0, bytes_accessed=bytes_accessed),
    )(cols, w_pad)

    # Fold BN into per-channel scale/shift (tiny (1, Cpad) scalar glue).
    # Zero pad rows contribute nothing to sum/sumsq (conv has no bias), so we
    # normalize by the real row count.
    inv_m = 1.0 / float(m_real)
    mean = csum * inv_m
    var = jnp.maximum(cssq * inv_m - mean * mean, 0.0)   # biased var, clamp cancellation
    inv_std = jax.lax.rsqrt(var + EPS)
    scale = gamma_pad.reshape(1, c_pad) * inv_std
    shift = beta_pad.reshape(1, c_pad) - mean * scale

    # Pass 2: normalize + affine + ReLU, per tile (parallel -> 2 TCs on v7x).
    out = pl.pallas_call(
        bn_relu_kernel,
        out_shape=jax.ShapeDtypeStruct((m_pad, c_pad), jnp.float32),
        grid_spec=pltpu.PrefetchScalarGridSpec(
            num_scalar_prefetch=0,
            grid=(n_m,),
            in_specs=[
                pl.BlockSpec((tm, c_pad), lambda m: (m, 0)),
                pl.BlockSpec((1, c_pad), lambda m: (0, 0)),
                pl.BlockSpec((1, c_pad), lambda m: (0, 0)),
            ],
            out_specs=pl.BlockSpec((tm, c_pad), lambda m: (m, 0)),
        ),
        compiler_params=pltpu.CompilerParams(
            dimension_semantics=("parallel",),
            vmem_limit_bytes=VMEM_LIMIT,
        ),
    )(z, scale, shift)
    return out


# ------------------------------ JAX glue --------------------------------------
def im2col_3x3(x_nhwc):
    """3x3, stride 1, padding 1 window extraction -> (N*H*W, 9*C)."""
    n, h, w, c = x_nhwc.shape
    xp = jnp.pad(x_nhwc, ((0, 0), (1, 1), (1, 1), (0, 0)))
    cols = [xp[:, ki:ki + h, kj:kj + w, :] for ki in range(3) for kj in range(3)]
    cols = jnp.concatenate(cols, axis=-1)            # (N, H, W, 9*C), (ki,kj,cin) order
    return cols.reshape(n * h * w, 9 * c)


def _prep_cols(x_nhwc, m_pad):
    """bf16 im2col, zero-padded along rows up to m_pad."""
    cols = im2col_3x3(x_nhwc.astype(jnp.bfloat16))
    m = cols.shape[0]
    return jnp.pad(cols, ((0, m_pad - m), (0, 0)))


def vgg_block(x_nchw, params, *, tm=512):
    n, _, h, w = x_nchw.shape
    x = jnp.transpose(x_nchw, (0, 2, 3, 1))          # NCHW -> NHWC

    cmid = params["g1"].shape[0]
    cout = params["g2"].shape[0]
    cmid_pad = _round_up(cmid, LANE)
    cout_pad = _round_up(cout, LANE)

    m = n * h * w
    tm = min(tm, _round_up(m, 8))                    # clamp tile to the problem
    m_pad = _round_up(m, tm)

    def pad_w(wt, cpad):
        # zero-padded output channels never affect real-channel BN statistics
        return jnp.pad(wt.astype(jnp.bfloat16), ((0, 0), (0, cpad - wt.shape[1])))

    def pad_vec(v, cpad):
        return jnp.pad(v.astype(jnp.float32), (0, cpad - v.shape[0]))

    # ---- layer 1: conv1 + bn1 + relu (bias omitted: cancelled by train-mode BN)
    cols1 = _prep_cols(x, m_pad)
    y1 = conv_bn_relu(cols1, pad_w(params["w1"], cmid_pad),
                      pad_vec(params["g1"], cmid_pad),
                      pad_vec(params["be1"], cmid_pad), m, tm=tm)
    y1 = y1[:m, :cmid].reshape(n, h, w, cmid)        # drop pad rows / pad channels

    # ---- layer 2: conv2 + bn2 + relu
    cols2 = _prep_cols(y1, m_pad)
    y2 = conv_bn_relu(cols2, pad_w(params["w2"], cout_pad),
                      pad_vec(params["g2"], cout_pad),
                      pad_vec(params["be2"], cout_pad), m, tm=tm)
    y2 = y2[:m, :cout].reshape(n, h, w, cout)

    return jnp.transpose(y2, (0, 3, 1, 2))           # NHWC -> NCHW


def init_params(key, in_channels, middle_channels, out_channels):
    ks = jax.random.split(key, 8)

    def conv_w(k, cin, cout):
        # PyTorch Conv2d weight is OIHW; convert to (9*cin, cout) matmul form
        # matching the im2col (ki, kj, cin) ordering.
        w = 0.1 * jax.random.normal(k, (cout, cin, 3, 3), jnp.float32)
        return jnp.transpose(w, (2, 3, 1, 0)).reshape(9 * cin, cout)

    return dict(
        w1=conv_w(ks[0], in_channels, middle_channels),
        b1=0.1 * jax.random.normal(ks[1], (middle_channels,), jnp.float32),
        g1=1.0 + 0.1 * jax.random.normal(ks[2], (middle_channels,), jnp.float32),
        be1=0.1 * jax.random.normal(ks[3], (middle_channels,), jnp.float32),
        w2=conv_w(ks[4], middle_channels, out_channels),
        b2=0.1 * jax.random.normal(ks[5], (out_channels,), jnp.float32),
        g2=1.0 + 0.1 * jax.random.normal(ks[6], (out_channels,), jnp.float32),
        be2=0.1 * jax.random.normal(ks[7], (out_channels,), jnp.float32),
    )


# --------------------- plain-JAX references (sanity checks) -------------------
def ref_layer(x_nhwc, w, b, g, be, *, quantize):
    n, h, ww, _ = x_nhwc.shape
    c = w.shape[1]
    cols = im2col_3x3(x_nhwc)
    if quantize:  # mirror the kernel's bf16 MXU inputs / f32 accumulation
        acc = jnp.dot(cols.astype(jnp.bfloat16), w.astype(jnp.bfloat16),
                      preferred_element_type=jnp.float32)
    else:         # faithful all-f32 module math
        acc = cols @ w
    acc = acc + b                      # bias kept in the reference (BN cancels it)
    mean = jnp.mean(acc, axis=0, keepdims=True)
    var = jnp.mean(jnp.square(acc - mean), axis=0, keepdims=True)
    y = (acc - mean) * jax.lax.rsqrt(var + EPS) * g + be
    return jnp.maximum(y, 0.0).reshape(n, h, ww, c)


def ref_vgg_block(x_nchw, p, *, quantize):
    x = jnp.transpose(x_nchw, (0, 2, 3, 1))
    y1 = ref_layer(x, p["w1"], p["b1"], p["g1"], p["be1"], quantize=quantize)
    y2 = ref_layer(y1, p["w2"], p["b2"], p["g2"], p["be2"], quantize=quantize)
    return jnp.transpose(y2, (0, 3, 1, 2))


if __name__ == "__main__":
    key = jax.random.PRNGKey(0)
    kx, kp = jax.random.split(key)

    N, Cin, H, W = 2, 4, 16, 16
    Cmid, Cout = 8, 8
    x = jax.random.normal(kx, (N, Cin, H, W), jnp.float32)
    params = init_params(kp, Cin, Cmid, Cout)

    # tm=256 -> 2 M-tiles at this size, exercising the multi-tile accumulator /
    # pipelining path; production default is 512-1024 rows.
    fwd = jax.jit(functools.partial(vgg_block, tm=256))
    out = jax.block_until_ready(fwd(x, params))
    assert out.shape == (N, Cout, H, W), out.shape

    # Tight check vs. a reference using the same bf16-quantized matmul inputs
    # (verifies the Pallas plumbing / BN accumulation exactly).
    ref_q = jax.block_until_ready(ref_vgg_block(x, params, quantize=True))
    np.testing.assert_allclose(np.asarray(out), np.asarray(ref_q),
                               rtol=5e-3, atol=5e-3)

    # Looser check vs. the faithful all-f32 module math (bf16 MXU inputs vs f32).
    ref_f = jax.block_until_ready(ref_vgg_block(x, params, quantize=False))
    np.testing.assert_allclose(np.asarray(out), np.asarray(ref_f),
                               rtol=2e-2, atol=2e-2)

    print("KERNEL_OK")
</pallas_src>

<mosaic_0001>
module attributes {stable_mosaic.version = 11 : i64} {
  func.func @conv_stats_kernel(%arg0: i32, %arg1: memref<256x36xbf16, #tpu.memory_space<vmem>>, %arg2: memref<36x128xbf16, #tpu.memory_space<vmem>>, %arg3: memref<256x128xf32, #tpu.memory_space<vmem>>, %arg4: memref<1x128xf32, #tpu.memory_space<vmem>>, %arg5: memref<1x128xf32, #tpu.memory_space<vmem>>) attributes {dimension_semantics = [#tpu.dimension_semantics<arbitrary>], iteration_bounds = array<i64: 2>, scalar_prefetch = 0 : i64, scratch_operands = 0 : i64, tpu.core_type = #tpu.core_type<tc>, window_params = [{transform_indices = @transform_0, window_bounds = array<i64: 256, 36>}, {pipeline_mode = #tpu.pipeline_mode<synchronous>, transform_indices = @transform_1, window_bounds = array<i64: 36, 128>}, {transform_indices = @transform_2, window_bounds = array<i64: 256, 128>}, {pipeline_mode = #tpu.pipeline_mode<synchronous>, transform_indices = @transform_3, window_bounds = array<i64: 1, 128>}, {pipeline_mode = #tpu.pipeline_mode<synchronous>, transform_indices = @transform_4, window_bounds = array<i64: 1, 128>}]} {
    %c0_i32 = arith.constant 0 : i32
    %0 = arith.cmpi eq, %arg0, %c0_i32 : i32
    %1 = arith.extui %0 : i1 to i32
    %c0_i32_0 = arith.constant 0 : i32
    %2 = arith.cmpi ne, %1, %c0_i32_0 : i32
    scf.if %2 {
      %cst_16 = arith.constant 0.000000e+00 : f32
      %18 = vector.broadcast %cst_16 : f32 to vector<1x128xf32>
      %c0_17 = arith.constant 0 : index
      %c0_18 = arith.constant 0 : index
      %19 = vector.load %arg4[%c0_17, %c0_18] : memref<1x128xf32, #tpu.memory_space<vmem>>, vector<1x128xf32>
      tpu.vector_store %arg4[%c0_17, %c0_18], %18 {strides = array<i32>} : memref<1x128xf32, #tpu.memory_space<vmem>>, vector<1x128xf32>,
      %cst_19 = arith.constant 0.000000e+00 : f32
      %20 = vector.broadcast %cst_19 : f32 to vector<1x128xf32>
      %c0_20 = arith.constant 0 : index
      %c0_21 = arith.constant 0 : index
      %21 = vector.load %arg5[%c0_20, %c0_21] : memref<1x128xf32, #tpu.memory_space<vmem>>, vector<1x128xf32>
      tpu.vector_store %arg5[%c0_20, %c0_21], %20 {strides = array<i32>} : memref<1x128xf32, #tpu.memory_space<vmem>>, vector<1x128xf32>,
    } else {
    }
    %c0 = arith.constant 0 : index
    %c0_1 = arith.constant 0 : index
    %3 = vector.load %arg1[%c0, %c0_1] : memref<256x36xbf16, #tpu.memory_space<vmem>>, vector<256x36xbf16>
    %c0_2 = arith.constant 0 : index
    %c0_3 = arith.constant 0 : index
    %4 = vector.load %arg2[%c0_2, %c0_3] : memref<36x128xbf16, #tpu.memory_space<vmem>>, vector<36x128xbf16>
    %cst = arith.constant dense<0.000000e+00> : vector<256x128xf32>
    %5 = tpu.matmul %3, %4, %cst {dimension_numbers = #tpu.dot_dimension_numbers<[1], [0], [0], [1], [0, 0, 1, 1], [], []>} : vector<256x36xbf16>, vector<36x128xbf16>, vector<256x128xf32> -> vector<256x128xf32>
    %c0_4 = arith.constant 0 : index
    %c0_5 = arith.constant 0 : index
    %6 = vector.load %arg3[%c0_4, %c0_5] : memref<256x128xf32, #tpu.memory_space<vmem>>, vector<256x128xf32>
    tpu.vector_store %arg3[%c0_4, %c0_5], %5 {strides = array<i32>} : memref<256x128xf32, #tpu.memory_space<vmem>>, vector<256x128xf32>,
    %c0_6 = arith.constant 0 : index
    %c0_7 = arith.constant 0 : index
    %7 = vector.load %arg4[%c0_6, %c0_7] : memref<1x128xf32, #tpu.memory_space<vmem>>, vector<1x128xf32>
    %cst_8 = arith.constant dense<0.000000e+00> : vector<128xf32>
    %8 = vector.multi_reduction <add>, %5, %cst_8 [0] : vector<256x128xf32> to vector<128xf32>
    %9 = vector.shape_cast %8 : vector<128xf32> to vector<1x128xf32>
    %10 = arith.addf %7, %9 : vector<1x128xf32>
    %c0_9 = arith.constant 0 : index
    %c0_10 = arith.constant 0 : index
    %11 = vector.load %arg4[%c0_9, %c0_10] : memref<1x128xf32, #tpu.memory_space<vmem>>, vector<1x128xf32>
    tpu.vector_store %arg4[%c0_9, %c0_10], %10 {strides = array<i32>} : memref<1x128xf32, #tpu.memory_space<vmem>>, vector<1x128xf32>,
    %c0_11 = arith.constant 0 : index
    %c0_12 = arith.constant 0 : index
    %12 = vector.load %arg5[%c0_11, %c0_12] : memref<1x128xf32, #tpu.memory_space<vmem>>, vector<1x128xf32>
    %13 = arith.mulf %5, %5 : vector<256x128xf32>
    %cst_13 = arith.constant dense<0.000000e+00> : vector<128xf32>
    %14 = vector.multi_reduction <add>, %13, %cst_13 [0] : vector<256x128xf32> to vector<128xf32>
    %15 = vector.shape_cast %14 : vector<128xf32> to vector<1x128xf32>
    %16 = arith.addf %12, %15 : vector<1x128xf32>
    %c0_14 = arith.constant 0 : index
    %c0_15 = arith.constant 0 : index
    %17 = vector.load %arg5[%c0_14, %c0_15] : memref<1x128xf32, #tpu.memory_space<vmem>>, vector<1x128xf32>
    tpu.vector_store %arg5[%c0_14, %c0_15], %16 {strides = array<i32>} : memref<1x128xf32, #tpu.memory_space<vmem>>, vector<1x128xf32>,
    return
  }
  func.func @transform_0(%arg0: i32) -> (i32, i32) {
    %c0_i32 = arith.constant 0 : i32
    %c0_i32_0 = arith.constant 0 : i32
    return %arg0, %c0_i32 : i32, i32
  }
  func.func @transform_1(%arg0: i32) -> (i32, i32) {
    %c0_i32 = arith.constant 0 : i32
    %c0_i32_0 = arith.constant 0 : i32
    %c0_i32_1 = arith.constant 0 : i32
    return %c0_i32, %c0_i32_0 : i32, i32
  }
  func.func @transform_2(%arg0: i32) -> (i32, i32) {
    %c0_i32 = arith.constant 0 : i32
    %c0_i32_0 = arith.constant 0 : i32
    return %arg0, %c0_i32 : i32, i32
  }
  func.func @transform_3(%arg0: i32) -> (i32, i32) {
    %c0_i32 = arith.constant 0 : i32
    %c0_i32_0 = arith.constant 0 : i32
    %c0_i32_1 = arith.constant 0 : i32
    return %c0_i32, %c0_i32_0 : i32, i32
  }
  func.func @transform_4(%arg0: i32) -> (i32, i32) {
    %c0_i32 = arith.constant 0 : i32
    %c0_i32_0 = arith.constant 0 : i32
    %c0_i32_1 = arith.constant 0 : i32
    return %c0_i32, %c0_i32_0 : i32, i32
  }
}

module attributes {stable_mosaic.version = 11 : i64} {
  func.func @bn_relu_kernel(%arg0: i32, %arg1: memref<256x128xf32, #tpu.memory_space<vmem>>, %arg2: memref<1x128xf32, #tpu.memory_space<vmem>>, %arg3: memref<1x128xf32, #tpu.memory_space<vmem>>, %arg4: memref<256x128xf32, #tpu.memory_space<vmem>>) attributes {dimension_semantics = [#tpu.dimension_semantics<parallel>], iteration_bounds = array<i64: 2>, scalar_prefetch = 0 : i64, scratch_operands = 0 : i64, tpu.core_type = #tpu.core_type<tc>, window_params = [{transform_indices = @transform_0, window_bounds = array<i64: 256, 128>}, {pipeline_mode = #tpu.pipeline_mode<synchronous>, transform_indices = @transform_1, window_bounds = array<i64: 1, 128>}, {pipeline_mode = #tpu.pipeline_mode<synchronous>, transform_indices = @transform_2, window_bounds = array<i64: 1, 128>}, {transform_indices = @transform_3, window_bounds = array<i64: 256, 128>}]} {
    %c0 = arith.constant 0 : index
    %c0_0 = arith.constant 0 : index
    %0 = vector.load %arg1[%c0, %c0_0] : memref<256x128xf32, #tpu.memory_space<vmem>>, vector<256x128xf32>
    %c0_1 = arith.constant 0 : index
    %c0_2 = arith.constant 0 : index
    %1 = vector.load %arg2[%c0_1, %c0_2] : memref<1x128xf32, #tpu.memory_space<vmem>>, vector<1x128xf32>
    %2 = vector.broadcast %1 : vector<1x128xf32> to vector<256x128xf32>
    %3 = arith.mulf %0, %2 : vector<256x128xf32>
    %c0_3 = arith.constant 0 : index
    %c0_4 = arith.constant 0 : index
    %4 = vector.load %arg3[%c0_3, %c0_4] : memref<1x128xf32, #tpu.memory_space<vmem>>, vector<1x128xf32>
    %5 = vector.broadcast %4 : vector<1x128xf32> to vector<256x128xf32>
    %6 = arith.addf %3, %5 : vector<256x128xf32>
    %cst = arith.constant 0.000000e+00 : f32
    %7 = vector.broadcast %cst : f32 to vector<256x128xf32>
    %8 = arith.maximumf %6, %7 : vector<256x128xf32>
    %c0_5 = arith.constant 0 : index
    %c0_6 = arith.constant 0 : index
    %9 = vector.load %arg4[%c0_5, %c0_6] : memref<256x128xf32, #tpu.memory_space<vmem>>, vector<256x128xf32>
    tpu.vector_store %arg4[%c0_5, %c0_6], %8 {strides = array<i32>} : memref<256x128xf32, #tpu.memory_space<vmem>>, vector<256x128xf32>,
    return
  }
  func.func @transform_0(%arg0: i32) -> (i32, i32) {
    %c0_i32 = arith.constant 0 : i32
    %c0_i32_0 = arith.constant 0 : i32
    return %arg0, %c0_i32 : i32, i32
  }
  func.func @transform_1(%arg0: i32) -> (i32, i32) {
    %c0_i32 = arith.constant 0 : i32
    %c0_i32_0 = arith.constant 0 : i32
    %c0_i32_1 = arith.constant 0 : i32
    return %c0_i32, %c0_i32_0 : i32, i32
  }
  func.func @transform_2(%arg0: i32) -> (i32, i32) {
    %c0_i32 = arith.constant 0 : i32
    %c0_i32_0 = arith.constant 0 : i32
    %c0_i32_1 = arith.constant 0 : i32
    return %c0_i32, %c0_i32_0 : i32, i32
  }
  func.func @transform_3(%arg0: i32) -> (i32, i32) {
    %c0_i32 = arith.constant 0 : i32
    %c0_i32_0 = arith.constant 0 : i32
    return %arg0, %c0_i32 : i32, i32
  }
}

module attributes {stable_mosaic.version = 11 : i64} {
  func.func @conv_stats_kernel(%arg0: i32, %arg1: memref<256x72xbf16, #tpu.memory_space<vmem>>, %arg2: memref<72x128xbf16, #tpu.memory_space<vmem>>, %arg3: memref<256x128xf32, #tpu.memory_space<vmem>>, %arg4: memref<1x128xf32, #tpu.memory_space<vmem>>, %arg5: memref<1x128xf32, #tpu.memory_space<vmem>>) attributes {dimension_semantics = [#tpu.dimension_semantics<arbitrary>], iteration_bounds = array<i64: 2>, scalar_prefetch = 0 : i64, scratch_operands = 0 : i64, tpu.core_type = #tpu.core_type<tc>, window_params = [{transform_indices = @transform_0, window_bounds = array<i64: 256, 72>}, {pipeline_mode = #tpu.pipeline_mode<synchronous>, transform_indices = @transform_1, window_bounds = array<i64: 72, 128>}, {transform_indices = @transform_2, window_bounds = array<i64: 256, 128>}, {pipeline_mode = #tpu.pipeline_mode<synchronous>, transform_indices = @transform_3, window_bounds = array<i64: 1, 128>}, {pipeline_mode = #tpu.pipeline_mode<synchronous>, transform_indices = @transform_4, window_bounds = array<i64: 1, 128>}]} {
    %c0_i32 = arith.constant 0 : i32
    %0 = arith.cmpi eq, %arg0, %c0_i32 : i32
    %1 = arith.extui %0 : i1 to i32
    %c0_i32_0 = arith.constant 0 : i32
    %2 = arith.cmpi ne, %1, %c0_i32_0 : i32
    scf.if %2 {
      %cst_16 = arith.constant 0.000000e+00 : f32
      %18 = vector.broadcast %cst_16 : f32 to vector<1x128xf32>
      %c0_17 = arith.constant 0 : index
      %c0_18 = arith.constant 0 : index
      %19 = vector.load %arg4[%c0_17, %c0_18] : memref<1x128xf32, #tpu.memory_space<vmem>>, vector<1x128xf32>
      tpu.vector_store %arg4[%c0_17, %c0_18], %18 {strides = array<i32>} : memref<1x128xf32, #tpu.memory_space<vmem>>, vector<1x128xf32>,
      %cst_19 = arith.constant 0.000000e+00 : f32
      %20 = vector.broadcast %cst_19 : f32 to vector<1x128xf32>
      %c0_20 = arith.constant 0 : index
      %c0_21 = arith.constant 0 : index
      %21 = vector.load %arg5[%c0_20, %c0_21] : memref<1x128xf32, #tpu.memory_space<vmem>>, vector<1x128xf32>
      tpu.vector_store %arg5[%c0_20, %c0_21], %20 {strides = array<i32>} : memref<1x128xf32, #tpu.memory_space<vmem>>, vector<1x128xf32>,
    } else {
    }
    %c0 = arith.constant 0 : index
    %c0_1 = arith.constant 0 : index
    %3 = vector.load %arg1[%c0, %c0_1] : memref<256x72xbf16, #tpu.memory_space<vmem>>, vector<256x72xbf16>
    %c0_2 = arith.constant 0 : index
    %c0_3 = arith.constant 0 : index
    %4 = vector.load %arg2[%c0_2, %c0_3] : memref<72x128xbf16, #tpu.memory_space<vmem>>, vector<72x128xbf16>
    %cst = arith.constant dense<0.000000e+00> : vector<256x128xf32>
    %5 = tpu.matmul %3, %4, %cst {dimension_numbers = #tpu.dot_dimension_numbers<[1], [0], [0], [1], [0, 0, 1, 1], [], []>} : vector<256x72xbf16>, vector<72x128xbf16>, vector<256x128xf32> -> vector<256x128xf32>
    %c0_4 = arith.constant 0 : index
    %c0_5 = arith.constant 0 : index
    %6 = vector.load %arg3[%c0_4, %c0_5] : memref<256x128xf32, #tpu.memory_space<vmem>>, vector<256x128xf32>
    tpu.vector_store %arg3[%c0_4, %c0_5], %5 {strides = array<i32>} : memref<256x128xf32, #tpu.memory_space<vmem>>, vector<256x128xf32>,
    %c0_6 = arith.constant 0 : index
    %c0_7 = arith.constant 0 : index
    %7 = vector.load %arg4[%c0_6, %c0_7] : memref<1x128xf32, #tpu.memory_space<vmem>>, vector<1x128xf32>
    %cst_8 = arith.constant dense<0.000000e+00> : vector<128xf32>
    %8 = vector.multi_reduction <add>, %5, %cst_8 [0] : vector<256x128xf32> to vector<128xf32>
    %9 = vector.shape_cast %8 : vector<128xf32> to vector<1x128xf32>
    %10 = arith.addf %7, %9 : vector<1x128xf32>
    %c0_9 = arith.constant 0 : index
    %c0_10 = arith.constant 0 : index
    %11 = vector.load %arg4[%c0_9, %c0_10] : memref<1x128xf32, #tpu.memory_space<vmem>>, vector<1x128xf32>
    tpu.vector_store %arg4[%c0_9, %c0_10], %10 {strides = array<i32>} : memref<1x128xf32, #tpu.memory_space<vmem>>, vector<1x128xf32>,
    %c0_11 = arith.constant 0 : index
    %c0_12 = arith.constant 0 : index
    %12 = vector.load %arg5[%c0_11, %c0_12] : memref<1x128xf32, #tpu.memory_space<vmem>>, vector<1x128xf32>
    %13 = arith.mulf %5, %5 : vector<256x128xf32>
    %cst_13 = arith.constant dense<0.000000e+00> : vector<128xf32>
    %14 = vector.multi_reduction <add>, %13, %cst_13 [0] : vector<256x128xf32> to vector<128xf32>
    %15 = vector.shape_cast %14 : vector<128xf32> to vector<1x128xf32>
    %16 = arith.addf %12, %15 : vector<1x128xf32>
    %c0_14 = arith.constant 0 : index
    %c0_15 = arith.constant 0 : index
    %17 = vector.load %arg5[%c0_14, %c0_15] : memref<1x128xf32, #tpu.memory_space<vmem>>, vector<1x128xf32>
    tpu.vector_store %arg5[%c0_14, %c0_15], %16 {strides = array<i32>} : memref<1x128xf32, #tpu.memory_space<vmem>>, vector<1x128xf32>,
    return
  }
  func.func @transform_0(%arg0: i32) -> (i32, i32) {
    %c0_i32 = arith.constant 0 : i32
    %c0_i32_0 = arith.constant 0 : i32
    return %arg0, %c0_i32 : i32, i32
  }
  func.func @transform_1(%arg0: i32) -> (i32, i32) {
    %c0_i32 = arith.constant 0 : i32
    %c0_i32_0 = arith.constant 0 : i32
    %c0_i32_1 = arith.constant 0 : i32
    return %c0_i32, %c0_i32_0 : i32, i32
  }
  func.func @transform_2(%arg0: i32) -> (i32, i32) {
    %c0_i32 = arith.constant 0 : i32
    %c0_i32_0 = arith.constant 0 : i32
    return %arg0, %c0_i32 : i32, i32
  }
  func.func @transform_3(%arg0: i32) -> (i32, i32) {
    %c0_i32 = arith.constant 0 : i32
    %c0_i32_0 = arith.constant 0 : i32
    %c0_i32_1 = arith.constant 0 : i32
    return %c0_i32, %c0_i32_0 : i32, i32
  }
  func.func @transform_4(%arg0: i32) -> (i32, i32) {
    %c0_i32 = arith.constant 0 : i32
    %c0_i32_0 = arith.constant 0 : i32
    %c0_i32_1 = arith.constant 0 : i32
    return %c0_i32, %c0_i32_0 : i32, i32
  }
}

</mosaic_0001>

<bundles_post_ra>
// kernel: vgg_block.5
= control target key start
LH: loop header
LB: loop body
LE: loop exit
PB: predicated region body
PF: predicated region fallthrough
CT: control target
= control target key end

     0   :  { %8 = vsyncpa [#allocation3], 0  ;;  %s1148_s0 = inlined_call_operand.hbm [shape: f32[512,128], index: 0, kind: input, shape index: {}]   ;;  %s1149_s1 = inlined_call_operand.hbm [shape: f32[1,128], index: 1, kind: input, shape index: {}]   ;;  %s1150_s2 = inlined_call_operand.hbm [shape: f32[1,128], index: 2, kind: input, shape index: {}]   ;;  %s1151_s3 = inlined_call_operand.hbm [shape: f32[512,128], index: 3, kind: output, shape index: {}]  }
   0x1   :  { %10 = vsyncpa [#allocation3 + $0x1], 0 }
   0x2   :  { %11 = vsyncpa [#allocation6], 0 }
   0x3   :  { %12 = vsyncpa [#allocation4], 0 }
   0x4   :  { %14 = vsyncpa [#allocation4 + $0x1], 0  ;;  %s775_s12 = smov 0   ;;  %s777_s13 = smov 0  }
   0x5   :  { %s779_s14 = smov 0   ;;  %s781_s15 = smov 0  }
   0x6 LB: > { %s796_s16 = sadd.s32 4294967295, %s745_s15   ;;  %s496_s17 = sadd.s32 4294967294, %s745_s15   ;;  %s745_s15 = sphi %s781_s15, %s1176_s15   ;;  %s741_s14 = sphi %s779_s14, %s1175_s14   ;;  %s737_s13 = sphi %s777_s13, %s1174_s13   ;;  %s733_s12 = sphi %s775_s12, %s1173_s12  }
   0x7   : > { %s800_s18 = sadd.s32 1, %s745_s15   ;;  %s27_s19 = sadd.s32 1, %s741_s14 }
   0x8   : > { %s24_s20 = ssub.s32 %s745_s15, %s800_s18  ;;  %p34_p0 = scmp.ne.s32.totalorder %s741_s14, %s737_s13 }
   0x9   : > { %p25_p1 = scmp.eq.s32.totalorder %s24_s20, 0  ;;  %p35_p2 = scmp.eq.s32.totalorder %s745_s15, 0 }
   0xa   : > { %p40_p3 = scmp.ne.s32.totalorder %s737_s13, %s733_s12  ;;  %p1152_p4 = scmp.eq.s32.totalorder %s796_s16, 0 }
   0xb   : > { %s812_s21 = scalar_select %p25_p1, %s741_s14, %s27_s19  }
   0xc   : > { %p814_p5 = por %p35_p2, %p34_p0  ;;  %p820_p6 = por %p1152_p4, %p40_p3 }
   0xd   : > { %p106_p7 = scmp.eq.s32.totalorder %s796_s16, 1  ;;  %p112_p8 = scmp.eq.s32.totalorder %s496_s17, 1 }
   0xe   : > { %s1158_s23 = scalar_select %p820_p6, 1, 0 }
   0xf   : > { %p497_p9 = scmp.ge.s32.totalorder %s745_s15, 1  ;;  %p119_p10 = scmp.lt.s32.totalorder %s745_s15, 3 }
  0x10   : > { %p827_p11 = por %p106_p7, %p34_p0  ;;  %p831_p12 = por %p112_p8, %p40_p3 }
  0x11   : > { %p835_p13 = pnand %p497_p9, %p119_p10  ;;  %s747_s27 = smov [#allocation5]  }
  0x12   : > { %s1159_s24 = scalar_select %p827_p11, 1, 0 }
  0x13   : > { %s1160_s25 = scalar_select %p831_p12, 1, 0 }
  0x14   : > { %s1161_s26 = scalar_select %p835_p13, 1, 0 }
  0x15   : > { %p530_p2 = pneg %p835_p13  ;;  %s132_s28 = sshll.u32 %s747_s27, 4  ;;  %s133_s28 = int_to_ptr.vmem [resolvable:$true] %s132_s28 }
  0x16   : > { %p547_p4 = scmp.lt.s32.totalorder %s745_s15, 2  ;;  %p1162_p0 = scmp.eq.s32.totalorder %s796_s16, 0 }
  0x17   : > { %s748_s4 = smov [#allocation7]   ;;  %s589_s8 = scalar_lea.hbm %s1149_s1, 16 }
  0x18   : > { %p845_p7 = pnand %p530_p2, %p1162_p0  ;;  %p851_p3 = pnand %p547_p4, %p814_p5 }
  0x19   : > { %s143_s5 = sshll.u32 %s748_s4, 4  ;;  %p590_p8 = scmp.ne.s32.totalorder %s1149_s1, %s589_s8  ;;  %s855_s5 = int_to_ptr.vmem [resolvable:$true] %s143_s5 }
  0x1a   : > { %s1164_s30 = scalar_select %p851_p3, 1, 0 }
  0x1b   : > { %p591_p9 = pneg %p845_p7  ;;  %p596_p10 = scmp.lt.u32.totalorder %s589_s8, %s1149_s1 }
  0x1d   : > { %p592_p4 = pnand %p591_p9, %p590_p8 }
  0x1f   : > { %p593_p5 = pneg %p592_p4 }
  0x21   : > { %p598_p2 = pnand %p596_p10, %p593_p5 }
  0x23   : > { %601 = shalt.err (!%p598_p2)
}
  0x24   : > { %s602_s19 = scalar_lea.vmem %s133_s28, 16  ;;  %s609_s20 = scalar_lea.vmem %s133_s28, 32 }
  0x25   : > { %p603_p0 = scmp.ne.s32.totalorder %s133_s28, %s602_s19  ;;  %p610_p11 = scmp.lt.s32.totalorder %s133_s28, %s133_s28 }
  0x26   : > { %p611_p6 = scmp.lt.s32.totalorder %s609_s20, %s602_s19 }
  0x27   : > { %p605_p1 = pnand %p603_p0, %p591_p9 }
  0x28   : > { %p612_p13 = por %p611_p6, %p610_p11 }
  0x29   : > { %p606_p12 = pneg %p605_p1 }
  0x2b   : > { %p613_p3 = pnand %p612_p13, %p606_p12 }
  0x2d   : > { %616 = shalt.err (!%p613_p3)
}
  0x2e   : > { %533 = dma.hbm_to_vmem [thread:$0]  (!%p845_p7), %s1149_s1, 16, %s133_s28, [#allocation6]  }
  0x2f   : > { %s154_s4 = sand.u32 1, %s741_s14   ;;  %s617_s8 = scalar_lea.hbm %s1150_s2, 16 }
  0x30   : > { %p618_p1 = scmp.ne.s32.totalorder %s1150_s2, %s617_s8  ;;  %p624_p12 = scmp.lt.u32.totalorder %s617_s8, %s1150_s2 }
  0x32   : > { %p620_p6 = pnand %p618_p1, %p591_p9 }
  0x34   : > { %p621_p11 = pneg %p620_p6 }
  0x36   : > { %p626_p13 = pnand %p624_p12, %p621_p11 }
  0x38   : > { %629 = shalt.err (!%p626_p13)
}
  0x39   : > { %s630_s28 = scalar_lea.vmem %s855_s5, 16  ;;  %s637_s19 = scalar_lea.vmem %s855_s5, 32 }
  0x3a   : > { %p631_p3 = scmp.ne.s32.totalorder %s855_s5, %s630_s28  ;;  %p638_p5 = scmp.lt.s32.totalorder %s855_s5, %s855_s5 }
  0x3b   : > { %p639_p10 = scmp.lt.s32.totalorder %s637_s19, %s630_s28 }
  0x3c   : > { %p633_p8 = pnand %p631_p3, %p591_p9 }
  0x3d   : > { %p640_p2 = por %p639_p10, %p638_p5 }
  0x3e   : > { %p634_p4 = pneg %p633_p8 }
  0x40   : > { %p641_p0 = pnand %p640_p2, %p634_p4 }
  0x42   : > { %644 = shalt.err (!%p641_p0)
}
  0x43   : > { %536 = dma.hbm_to_vmem [thread:$0]  (!%p845_p7), %s1150_s2, 16, %s855_s5, [#allocation6]  }
  0x44   : > { %s501_s27 = sshll.u32 %s154_s4, 8  ;;  %s516_s6 = sshll.u32 %s745_s15, 12 }
  0x45   : > { %s910_s9 = scalar_lea.hbm %s1148_s0, %s516_s6  ;;  %s158_s29 = scalar_lea.vmem [#allocation2], %s501_s27 }
  0x46   : > { %s165_s10 = sshll.u32 %s158_s29, 4  ;;  %s914_s11 = scalar_lea.sflag [#allocation3], %s154_s4  ;;  %s912_s10 = int_to_ptr.vmem [resolvable:$true] %s165_s10 }
  0x47   : > { %s645_s17 = scalar_lea.hbm %s910_s9, 4096  ;;  %p1165_p7 = scmp.ne.s32.totalorder %s1164_s30, 0 }
  0x48   : > { %p646_p9 = scmp.ne.s32.totalorder %s910_s9, %s645_s17  ;;  %s650_s19 = scalar_lea.hbm %s1148_s0, 8192 }
  0x49   : > { %p647_p1 = pneg %p1165_p7  ;;  %p651_p12 = scmp.lt.u32.totalorder %s910_s9, %s1148_s0 }
  0x4a   : > { %p652_p13 = scmp.lt.u32.totalorder %s650_s19, %s645_s17  ;;  %p654_p8 = scmp.lt.u32.totalorder %s645_s17, %s910_s9 }
  0x4b   : > { %p648_p6 = pnand %p647_p1, %p646_p9 }
  0x4c   : > { %p653_p3 = por %p652_p13, %p651_p12 }
  0x4d   : > { %p649_p11 = pneg %p648_p6 }
  0x4e   : > { %p655_p4 = por %p654_p8, %p653_p3 }
  0x50   : > { %p656_p5 = pnand %p655_p4, %p649_p11 }
  0x52   : > { %659 = shalt.err (!%p656_p5)
}
  0x53   : > { %s660_s4 = scalar_lea.vmem %s912_s10, 4096  ;;  %s749_s27 = smov [#allocation2]  }
  0x54   : > { %p661_p10 = scmp.ne.s32.totalorder %s912_s10, %s660_s4  ;;  %s665_s6 = sshll.u32 %s749_s27, 4  ;;  %s666_s6 = int_to_ptr.vmem [resolvable:$false] %s665_s6 }
  0x55   : > { %s667_s7 = scalar_lea.vmem %s666_s6, 8192  ;;  %p668_p9 = scmp.lt.s32.totalorder %s912_s10, %s666_s6 }
  0x56   : > { %p663_p2 = pnand %p661_p10, %p647_p1  ;;  %p669_p6 = scmp.lt.s32.totalorder %s667_s7, %s660_s4 }
  0x58   : > { %p664_p0 = pneg %p663_p2  ;;  %p670_p12 = por %p669_p6, %p668_p9 }
  0x5a   : > { %p671_p13 = pnand %p670_p12, %p664_p0 }
  0x5c   : > { %674 = shalt.err (!%p671_p13)
}
  0x5d   : > { %s750_s8 = smov 128   ;;  %s751_s29 = smov 8  }
  0x5e   : > { %540 = dma.hbm_to_vmem [thread:$0]  (!%p1165_p7), %s910_s9, 4096, %s912_s10, %s914_s11, %s750_s8, %s750_s8, %s751_s29  }
  0x5f   : > { %p1166_p1 = scmp.ne.s32.totalorder %s1161_s26, 0 }
  0x60   : > { %s945_s17 = sand.u32 (!%p1166_p1), 1, %s737_s13   ;;  %p1167_p11 = scmp.ne.s32.totalorder (!%p1166_p1), %s1158_s23, 0 }
  0x61   : > { %177 = sbr.rel (%p1166_p1) target bundleno = 153 (0x99), region = 32  ;;  %s505_s5 = sshll.u32 (!%p1166_p1), %s945_s17, 8 }
  0x62   : > { %s180_s28 = scalar_lea.sflag (!%p1166_p1), [#allocation3], %s945_s17  ;;  %s951_s19 = scalar_lea.vmem (!%p1166_p1), [#allocation2], %s505_s5 }
  0x68   : > { %720 = dma.done.wait (%p1167_p11), %s180_s28, 4096  }
  0x69   : > { %722 = vsyncadd (%p1167_p11), %s180_s28, 4294963200  ;;  %p1168_p7 = scmp.eq.s32.totalorder %s796_s16, 0 }
  0x6b   : > { %724 = dma.done.wait (%p1168_p7), [#allocation6], 32   ;;  %p1169_p3 = pmov %p1168_p7 }
  0x6c   : > { %v216_v0 = vld [vmem:[%s951_s19] sm:$0xff]  ;;  %v217_v4 = vld [vmem:[%s951_s19 + $0x8] sm:$0xff]  ;;  %v218_v5 = vld [vmem:[%s951_s19 + $0x10] sm:$0xff]  ;;  %s998_s23 = scalar_lea.vmem [#allocation8], %s505_s5  ;;  %s517_s26 = sshll.u32 %s796_s16, 12 }
  0x6d   : > { %726 = vsyncadd (%p1169_p3), [#allocation6], 4294967264  ;;  %v962_v1 = vld [vmem:[#allocation5] ss:$0 sm:$0xff]  ;;  %v964_v2 = vld [vmem:[#allocation7] ss:$0 sm:$0xff]  ;;  %s1095_s10 = scalar_lea.hbm %s1151_s3, %s517_s26 }
  0x6e   : > { %v255_v3 = vmul.f32 %v962_v1, %v216_v0  ;;  %v219_v6 = vld [vmem:[%s951_s19 + $0x18] sm:$0xff]  ;;  %v256_v7 = vmul.f32 %v962_v1, %v217_v4  ;;  %v257_v8 = vmul.f32 %v962_v1, %v218_v5  ;;  %v220_v10 = vld [vmem:[%s951_s19 + $0x20] sm:$0xff]  ;;  %v221_v11 = vld [vmem:[%s951_s19 + $0x28] sm:$0xff]  ;;  %s404_s30 = sshll.u32 %s998_s23, 4  ;;  %s391_s11 = scalar_lea.sflag [#allocation4], %s945_s17  ;;  %s1097_s30 = int_to_ptr.vmem [resolvable:$true] %s404_s30 }
  0x6f   : > { %v258_v9 = vmul.f32 %v962_v1, %v219_v6  ;;  %v222_v12 = vld [vmem:[%s951_s19 + $0x30] sm:$0xff]  ;;  %v259_v14 = vmul.f32 %v962_v1, %v220_v10  ;;  %v260_v15 = vmul.f32 %v962_v1, %v221_v11  ;;  %v223_v17 = vld [vmem:[%s951_s19 + $0x38] sm:$0xff]  ;;  %v224_v22 = vld [vmem:[%s951_s19 + $0x40] sm:$0xff]  ;;  %s675_s20 = scalar_lea.vmem %s1097_s30, 4096  ;;  %p1170_p4 = scmp.ne.s32.totalorder %s1159_s24, 0 }
  0x70   : > { %v294_v13 = vadd.f32 %v964_v2, %v255_v3  ;;  %v261_v16 = vmul.f32 %v962_v1, %v222_v12  ;;  %v295_v18 = vadd.f32 %v964_v2, %v256_v7  ;;  %v296_v19 = vadd.f32 %v964_v2, %v257_v8  ;;  %v225_v27 = vld [vmem:[%s951_s19 + $0x48] sm:$0xff]  ;;  %v226_v28 = vld [vmem:[%s951_s19 + $0x50] sm:$0xff]  ;;  %v227_v29 = vld [vmem:[%s951_s19 + $0x58] sm:$0xff]  ;;  %p676_p8 = scmp.ne.s32.totalorder %s1097_s30, %s675_s20  ;;  %s752_s22 = smov [#allocation8]  }
  0x71   : > { %v297_v20 = vadd.f32 %v964_v2, %v258_v9  ;;  %v262_v21 = vmul.f32 %v962_v1, %v223_v17  ;;  %v298_v24 = vadd.f32 %v964_v2, %v259_v14  ;;  %v299_v25 = vadd.f32 %v964_v2, %v260_v15  ;;  %v228_v34 = vld [vmem:[%s951_s19 + $0x60] sm:$0xff]  ;;  %v229_v35 = vld [vmem:[%s951_s19 + $0x68] sm:$0xff]  ;;  %v230_v36 = vld [vmem:[%s951_s19 + $0x70] sm:$0xff]  ;;  %s679_s4 = sshll.u32 %s752_s22, 4  ;;  %s680_s4 = int_to_ptr.vmem [resolvable:$false] %s679_s4 }
  0x72   : > { %v326_v23 = vmax.f32 %v294_v13, 0.0  ;;  %v300_v26 = vadd.f32 %v964_v2, %v261_v16  ;;  %v327_v30 = vmax.f32 %v295_v18, 0.0  ;;  %v328_v31 = vmax.f32 %v296_v19, 0.0  ;;  %v231_v41 = vld [vmem:[%s951_s19 + $0x78] sm:$0xff]  ;;  %v232_v54 = vld [vmem:[%s951_s19 + $0x80] sm:$0xff]  ;;  %v233_v59 = vld [vmem:[%s951_s19 + $0x88] sm:$0xff]  ;;  %p677_p5 = pnand %p676_p8, %p1170_p4  ;;  %p682_p2 = scmp.lt.s32.totalorder %s1097_s30, %s680_s4 }
  0x73   : > { %v329_v32 = vmax.f32 %v297_v20, 0.0  ;;  %v301_v33 = vadd.f32 %v964_v2, %v262_v21  ;;  %v330_v37 = vmax.f32 %v298_v24, 0.0  ;;  %v331_v38 = vmax.f32 %v299_v25, 0.0  ;;  %v234_v60 = vld [vmem:[%s951_s19 + $0x90] sm:$0xff]  ;;  %v235_v61 = vld [vmem:[%s951_s19 + $0x98] sm:$0xff]  ;;  %v236_v4 = vld [vmem:[%s951_s19 + $0xa0] sm:$0xff] }
  0x74   : > { %358 = vst [vmem:[%s998_s23] sm:$0xff] %v326_v23  ;;  %v332_v39 = vmax.f32 %v300_v26, 0.0  ;;  %v263_v40 = vmul.f32 %v962_v1, %v224_v22  ;;  %359 = vst [vmem:[%s998_s23 + $0x8] sm:$0xff] %v327_v30  ;;  %v264_v43 = vmul.f32 %v962_v1, %v225_v27  ;;  %v265_v44 = vmul.f32 %v962_v1, %v226_v28  ;;  %v237_v5 = vld [vmem:[%s951_s19 + $0xa8] sm:$0xff]  ;;  %v238_v6 = vld [vmem:[%s951_s19 + $0xb0] sm:$0xff]  ;;  %p678_p10 = pneg %p677_p5  ;;  %s681_s27 = scalar_lea.vmem %s680_s4, 8192 }
  0x75   : > { %360 = vst [vmem:[%s998_s23 + $0x10] sm:$0xff] %v328_v31  ;;  %361 = vst [vmem:[%s998_s23 + $0x18] sm:$0xff] %v329_v32  ;;  %v333_v42 = vmax.f32 %v301_v33, 0.0  ;;  %v266_v45 = vmul.f32 %v962_v1, %v227_v29  ;;  %v267_v47 = vmul.f32 %v962_v1, %v228_v34  ;;  %v268_v48 = vmul.f32 %v962_v1, %v229_v35  ;;  %v239_v11 = vld [vmem:[%s951_s19 + $0xb8] sm:$0xff]  ;;  %v240_v24 = vld [vmem:[%s951_s19 + $0xc0] sm:$0xff]  ;;  %p683_p0 = scmp.lt.s32.totalorder %s681_s27, %s675_s20 }
  0x76   : > { %362 = vst [vmem:[%s998_s23 + $0x20] sm:$0xff] %v330_v37  ;;  %363 = vst [vmem:[%s998_s23 + $0x28] sm:$0xff] %v331_v38  ;;  %v302_v46 = vadd.f32 %v964_v2, %v263_v40  ;;  %v269_v49 = vmul.f32 %v962_v1, %v230_v36  ;;  %v303_v50 = vadd.f32 %v964_v2, %v264_v43  ;;  %v241_v29 = vld [vmem:[%s951_s19 + $0xc8] sm:$0xff]  ;;  %v242_v30 = vld [vmem:[%s951_s19 + $0xd0] sm:$0xff] }
  0x77   : > { %364 = vst [vmem:[%s998_s23 + $0x30] sm:$0xff] %v332_v39  ;;  %365 = vst [vmem:[%s998_s23 + $0x38] sm:$0xff] %v333_v42  ;;  %v304_v51 = vadd.f32 %v964_v2, %v265_v44  ;;  %v305_v52 = vadd.f32 %v964_v2, %v266_v45  ;;  %v270_v53 = vmul.f32 %v962_v1, %v231_v41  ;;  %v243_v31 = vld [vmem:[%s951_s19 + $0xd8] sm:$0xff]  ;;  %v244_v36 = vld [vmem:[%s951_s19 + $0xe0] sm:$0xff]  ;;  %p684_p9 = por %p683_p0, %p682_p2 }
  0x78   : > { %v334_v55 = vmax.f32 %v302_v46, 0.0  ;;  %v306_v56 = vadd.f32 %v964_v2, %v267_v47  ;;  %v307_v57 = vadd.f32 %v964_v2, %v268_v48  ;;  %v308_v58 = vadd.f32 %v964_v2, %v269_v49  ;;  %v245_v37 = vld [vmem:[%s951_s19 + $0xe8] sm:$0xff]  ;;  %v246_v38 = vld [vmem:[%s951_s19 + $0xf0] sm:$0xff]  ;;  %v247_v43 = vld [vmem:[%s951_s19 + $0xf8] sm:$0xff] }
  0x79   : > { %v335_v62 = vmax.f32 %v303_v50, 0.0  ;;  %v336_v63 = vmax.f32 %v304_v51, 0.0  ;;  %v337_v0 = vmax.f32 %v305_v52, 0.0  ;;  %v309_v3 = vadd.f32 %v964_v2, %v270_v53  ;;  %p685_p6 = pnand %p684_p9, %p678_p10 }
  0x7a   : > { %366 = vst [vmem:[%s998_s23 + $0x40] sm:$0xff] %v334_v55  ;;  %v338_v7 = vmax.f32 %v306_v56, 0.0  ;;  %v339_v8 = vmax.f32 %v307_v57, 0.0  ;;  %v340_v9 = vmax.f32 %v308_v58, 0.0  ;;  %v271_v10 = vmul.f32 %v962_v1, %v232_v54 }
  0x7b   : > { %367 = vst [vmem:[%s998_s23 + $0x48] sm:$0xff] %v335_v62  ;;  %368 = vst [vmem:[%s998_s23 + $0x50] sm:$0xff] %v336_v63  ;;  %v341_v12 = vmax.f32 %v309_v3, 0.0  ;;  %v272_v13 = vmul.f32 %v962_v1, %v233_v59  ;;  %v273_v14 = vmul.f32 %v962_v1, %v234_v60  ;;  %v274_v15 = vmul.f32 %v962_v1, %v235_v61 }
  0x7c   : > { %369 = vst [vmem:[%s998_s23 + $0x58] sm:$0xff] %v337_v0  ;;  %370 = vst [vmem:[%s998_s23 + $0x60] sm:$0xff] %v338_v7  ;;  %v310_v16 = vadd.f32 %v964_v2, %v271_v10  ;;  %v275_v17 = vmul.f32 %v962_v1, %v236_v4  ;;  %v276_v18 = vmul.f32 %v962_v1, %v237_v5 }
  0x7d   : > { %371 = vst [vmem:[%s998_s23 + $0x68] sm:$0xff] %v339_v8  ;;  %372 = vst [vmem:[%s998_s23 + $0x70] sm:$0xff] %v340_v9  ;;  %v277_v19 = vmul.f32 %v962_v1, %v238_v6  ;;  %v311_v20 = vadd.f32 %v964_v2, %v272_v13  ;;  %v312_v21 = vadd.f32 %v964_v2, %v273_v14 }
  0x7e   : > { %373 = vst [vmem:[%s998_s23 + $0x78] sm:$0xff] %v341_v12  ;;  %v313_v22 = vadd.f32 %v964_v2, %v274_v15  ;;  %v278_v23 = vmul.f32 %v962_v1, %v239_v11  ;;  %v342_v25 = vmax.f32 %v310_v16, 0.0  ;;  %v314_v26 = vadd.f32 %v964_v2, %v275_v17 }
  0x7f   : > { %v315_v27 = vadd.f32 %v964_v2, %v276_v18  ;;  %v316_v28 = vadd.f32 %v964_v2, %v277_v19  ;;  %v343_v32 = vmax.f32 %v311_v20, 0.0  ;;  %v344_v33 = vmax.f32 %v312_v21, 0.0 }
  0x80   : > { %v345_v34 = vmax.f32 %v313_v22, 0.0  ;;  %v317_v35 = vadd.f32 %v964_v2, %v278_v23  ;;  %374 = vst [vmem:[%s998_s23 + $0x80] sm:$0xff] %v342_v25  ;;  %v346_v39 = vmax.f32 %v314_v26, 0.0  ;;  %v279_v42 = vmul.f32 %v962_v1, %v240_v24 }
  0x81   : > { %v347_v40 = vmax.f32 %v315_v27, 0.0  ;;  %v348_v41 = vmax.f32 %v316_v28, 0.0  ;;  %375 = vst [vmem:[%s998_s23 + $0x88] sm:$0xff] %v343_v32  ;;  %376 = vst [vmem:[%s998_s23 + $0x90] sm:$0xff] %v344_v33  ;;  %v280_v45 = vmul.f32 %v962_v1, %v241_v29  ;;  %v281_v46 = vmul.f32 %v962_v1, %v242_v30 }
  0x82   : > { %377 = vst [vmem:[%s998_s23 + $0x98] sm:$0xff] %v345_v34  ;;  %v349_v44 = vmax.f32 %v317_v35, 0.0  ;;  %v282_v47 = vmul.f32 %v962_v1, %v243_v31  ;;  %378 = vst [vmem:[%s998_s23 + $0xa0] sm:$0xff] %v346_v39  ;;  %v318_v48 = vadd.f32 %v964_v2, %v279_v42  ;;  %v283_v49 = vmul.f32 %v962_v1, %v244_v36 }
  0x83   : > { %379 = vst [vmem:[%s998_s23 + $0xa8] sm:$0xff] %v347_v40  ;;  %380 = vst [vmem:[%s998_s23 + $0xb0] sm:$0xff] %v348_v41  ;;  %v284_v50 = vmul.f32 %v962_v1, %v245_v37  ;;  %v285_v51 = vmul.f32 %v962_v1, %v246_v38  ;;  %v319_v52 = vadd.f32 %v964_v2, %v280_v45 }
  0x84   : > { %381 = vst [vmem:[%s998_s23 + $0xb8] sm:$0xff] %v349_v44  ;;  %v320_v53 = vadd.f32 %v964_v2, %v281_v46  ;;  %v321_v54 = vadd.f32 %v964_v2, %v282_v47  ;;  %v286_v55 = vmul.f32 %v962_v1, %v247_v43  ;;  %v350_v56 = vmax.f32 %v318_v48, 0.0 }
  0x85   : > { %v322_v57 = vadd.f32 %v964_v2, %v283_v49  ;;  %v323_v58 = vadd.f32 %v964_v2, %v284_v50  ;;  %v324_v59 = vadd.f32 %v964_v2, %v285_v51  ;;  %v351_v60 = vmax.f32 %v319_v52, 0.0 }
  0x86   : > { %v352_v61 = vmax.f32 %v320_v53, 0.0  ;;  %v353_v62 = vmax.f32 %v321_v54, 0.0  ;;  %v325_v1 = vadd.f32 %v964_v2, %v286_v55  ;;  %382 = vst [vmem:[%s998_s23 + $0xc0] sm:$0xff] %v350_v56 }
  0x87   : > { %v354_v63 = vmax.f32 %v322_v57, 0.0  ;;  %v355_v0 = vmax.f32 %v323_v58, 0.0  ;;  %v356_v3 = vmax.f32 %v324_v59, 0.0  ;;  %383 = vst [vmem:[%s998_s23 + $0xc8] sm:$0xff] %v351_v60 }
  0x88   : > { %384 = vst [vmem:[%s998_s23 + $0xd0] sm:$0xff] %v352_v61  ;;  %385 = vst [vmem:[%s998_s23 + $0xd8] sm:$0xff] %v353_v62  ;;  %v357_v4 = vmax.f32 %v325_v1, 0.0 }
  0x89   : > { %386 = vst [vmem:[%s998_s23 + $0xe0] sm:$0xff] %v354_v63  ;;  %387 = vst [vmem:[%s998_s23 + $0xe8] sm:$0xff] %v355_v0 }
  0x8a   : > { %388 = vst [vmem:[%s998_s23 + $0xf0] sm:$0xff] %v356_v3  ;;  %389 = vst [vmem:[%s998_s23 + $0xf8] sm:$0xff] %v357_v4 }
  0x8b   : > { %688 = shalt.err (!%p685_p6)
}
  0x8c   : > { %s689_s6 = scalar_lea.hbm %s1095_s10, 4096  ;;  %s693_s29 = scalar_lea.hbm %s1151_s3, 8192 }
  0x8d   : > { %p690_p12 = scmp.ne.s32.totalorder %s1095_s10, %s689_s6  ;;  %p694_p11 = scmp.lt.u32.totalorder %s1095_s10, %s1151_s3 }
  0x8e   : > { %p695_p7 = scmp.lt.u32.totalorder %s693_s29, %s689_s6  ;;  %p697_p8 = scmp.lt.u32.totalorder %s689_s6, %s1095_s10 }
  0x8f   : > { %p691_p13 = pnand %p690_p12, %p1170_p4 }
  0x90   : > { %p696_p3 = por %p695_p7, %p694_p11 }
  0x91   : > { %p692_p1 = pneg %p691_p13 }
  0x92   : > { %p698_p5 = por %p697_p8, %p696_p3 }
  0x94   : > { %p699_p10 = pnand %p698_p5, %p692_p1 }
  0x96   : > { %702 = shalt.err (!%p699_p10)
}
  0x97   : > { %s753_s19 = smov 128   ;;  %s754_s23 = smov 8  }
  0x98   : > { %528 = dma.vmem_to_hbm [thread:$0]  (%p1170_p4), %s1097_s30, 4096, %s1095_s10, %s391_s11, %s753_s19, %s753_s19, %s754_s23  }
  0x99 PF: > { %s419_s26 = sand.u32 1, %s733_s12   ;;  %p1171_p2 = scmp.ne.s32.totalorder %s1160_s25, 0 }
  0x9a   : > { %p1172_p0 = scmp.ge.s32.totalorder %s745_s15, 2  ;;  %s420_s16 = scalar_lea.sflag [#allocation4], %s419_s26 }
  0x9c   : > { %p542_p9 = pnand %p1172_p0, %p1171_p2 }
  0x9e   : > { %728 = dma.done.wait (!%p542_p9), %s420_s16, 4096  }
  0x9f   : > { %730 = vsyncadd (!%p542_p9), %s420_s16, 4294963200  ;;  %p17_p6 = scmp.ge.s32.totalorder %s800_s18, 4   ;;  %s1173_s12 = smov %s737_s13 }
  0xa0   : > { %s1174_s13 = smov %s741_s14  ;;  %s1175_s14 = smov %s812_s21 }
  0xa1   : > { %s1176_s15 = smov %s800_s18  ;;  %19 = sbr.rel (!%p17_p6) target bundleno = 6 (0x6), region = 85 }
  0xa8   :  { %425 = vsyncpa [#allocation3], 1 }
  0xa9   :  { %427 = vsyncpa [#allocation3 + $0x1], 1 }
  0xaa   :  { %428 = vsyncpa [#allocation6], 1 }
  0xab   :  { %429 = vsyncpa [#allocation4], 1 }
  0xac   :  { %431 = vsyncpa [#allocation4 + $0x1], 1 }

// kernel: vgg_block.4
= control target key start
LH: loop header
LB: loop body
LE: loop exit
PB: predicated region body
PF: predicated region fallthrough
CT: control target
= control target key end

     0   :  { %10 = vsyncpa [#allocation3], 0  ;;  %s1729_s0 = inlined_call_operand.hbm [shape: bf16[512,36], index: 0, kind: input, shape index: {}]   ;;  %s1730_s1 = inlined_call_operand.hbm [shape: bf16[36,128], index: 1, kind: input, shape index: {}]   ;;  %s1731_s2 = inlined_call_operand.hbm [shape: f32[512,128], index: 2, kind: output, shape index: {0}]   ;;  %s1732_s3 = inlined_call_operand.hbm [shape: f32[1,128], index: 3, kind: output, shape index: {1}]   ;;  %s1733_s4 = inlined_call_operand.hbm [shape: f32[1,128], index: 4, kind: output, shape index: {2}]  }
   0x1   :  { %12 = vsyncpa [#allocation3 + $0x1], 0 }
   0x2   :  { %13 = vsyncpa [#allocation6], 0 }
   0x3   :  { %14 = vsyncpa [#allocation4], 0 }
   0x4   :  { %16 = vsyncpa [#allocation4 + $0x1], 0 }
   0x5   :  { %17 = vsyncpa [#allocation9], 0  ;;  %s1305_s15 = smov 0   ;;  %s1307_s16 = smov 0  }
   0x6   :  { %s1309_s17 = smov 0   ;;  %s1311_s18 = smov 0  }
   0x7 LB: > { %s1326_s19 = sadd.s32 4294967295, %s1268_s18   ;;  %s866_s20 = sadd.s32 4294967294, %s1268_s18   ;;  %s1268_s18 = sphi %s1311_s18, %s1761_s18   ;;  %s1264_s17 = sphi %s1309_s17, %s1760_s17   ;;  %s1260_s16 = sphi %s1307_s16, %s1759_s16   ;;  %s1256_s15 = sphi %s1305_s15, %s1758_s15  }
   0x8   : > { %p43_p0 = scmp.ne.s32.totalorder %s1260_s16, %s1256_s15  ;;  %p1734_p1 = scmp.eq.s32.totalorder %s1326_s19, 0 }
   0x9   : > { %p94_p3 = scmp.eq.s32.totalorder %s866_s20, 1  ;;  %p867_p5 = scmp.ge.s32.totalorder %s1268_s18, 1 }
   0xa   : > { %p1335_p4 = por %p1734_p1, %p43_p0  ;;  %p143_p7 = scmp.lt.s32.totalorder %s1268_s18, 3 }
   0xb   : > { %p1340_p6 = por %p94_p3, %p43_p0  ;;  %s1270_s24 = smov [#allocation5]  }
   0xc   : > { %s1737_s21 = scalar_select %p1335_p4, 1, 0 }
   0xd   : > { %s1738_s22 = scalar_select %p1340_p6, 1, 0 }
   0xe   : > { %p1346_p9 = pnand %p867_p5, %p143_p7  ;;  %s155_s25 = sshll.u32 %s1270_s24, 4  ;;  %s1350_s25 = int_to_ptr.vmem [resolvable:$true] %s155_s25 }
   0xf   : > { %s1362_s27 = sadd.s32 1, %s1268_s18   ;;  %s30_s28 = sadd.s32 1, %s1264_s17 }
  0x10   : > { %s1739_s23 = scalar_select %p1346_p9, 1, 0 }
  0x11   : > { %p1005_p10 = pneg %p1346_p9  ;;  %s27_s29 = ssub.s32 %s1268_s18, %s1362_s27 }
  0x12   : > { %s1084_s6 = scalar_lea.hbm %s1730_s1, 320 }
  0x13   : > { %p1357_p12 = pnand %p1005_p10, %p1734_p1  ;;  %p1085_p13 = scmp.ne.s32.totalorder %s1730_s1, %s1084_s6 }
  0x14   : > { %p1091_p7 = scmp.lt.u32.totalorder %s1084_s6, %s1730_s1 }
  0x15   : > { %p1086_p0 = pneg %p1357_p12 }
  0x17   : > { %p1087_p3 = pnand %p1086_p0, %p1085_p13 }
  0x19   : > { %p1088_p5 = pneg %p1087_p3 }
  0x1b   : > { %p1093_p10 = pnand %p1091_p7, %p1088_p5 }
  0x1d   : > { %1096 = shalt.err (!%p1093_p10)
}
  0x1e   : > { %s1097_s11 = scalar_lea.vmem %s1350_s25, 320  ;;  %p1105_p2 = scmp.lt.s32.totalorder %s1350_s25, %s1350_s25 }
  0x1f   : > { %p1098_p11 = scmp.ne.s32.totalorder %s1350_s25, %s1097_s11  ;;  %p1106_p6 = scmp.lt.s32.totalorder %s1097_s11, %s1097_s11 }
  0x21   : > { %p1100_p8 = pnand %p1098_p11, %p1086_p0  ;;  %p1107_p4 = por %p1106_p6, %p1105_p2 }
  0x23   : > { %p1101_p1 = pneg %p1100_p8 }
  0x25   : > { %p1108_p9 = pnand %p1107_p4, %p1101_p1 }
  0x27   : > { %1111 = shalt.err (!%p1108_p9)
}
  0x28   : > { %s1271_s12 = smov 64   ;;  %s1272_s13 = smov 4  }
  0x29   : > { %1008 = dma.hbm_to_vmem [thread:$0]  (!%p1357_p12), %s1730_s1, 320, %s1350_s25, [#allocation6], %s1271_s12, %s1271_s12, %s1272_s13  }
  0x2a   : > { %p28_p1 = scmp.eq.s32.totalorder %s27_s29, 0  ;;  %p37_p2 = scmp.ne.s32.totalorder %s1264_s17, %s1260_s16 }
  0x2b   : > { %p38_p4 = scmp.eq.s32.totalorder %s1268_s18, 0  ;;  %p1018_p6 = scmp.lt.s32.totalorder %s1268_s18, 2 }
  0x2c   : > { %s1396_s24 = scalar_select %p28_p1, %s1264_s17, %s30_s28  }
  0x2d   : > { %p39_p8 = por %p38_p4, %p37_p2  ;;  %p1741_p9 = scmp.eq.s32.totalorder %s1326_s19, 1 }
  0x2e   : > { %s169_s26 = sand.u32 1, %s1264_s17   ;;  %s922_s5 = sshll.u32 %s1268_s18, 11 }
  0x2f   : > { %p1400_p11 = por %p1741_p9, %p37_p2  ;;  %s870_s6 = sshll.u32 %s169_s26, 7 }
  0x30   : > { %s1409_s9 = scalar_lea.hbm %s1729_s0, %s922_s5  ;;  %s173_s25 = scalar_lea.vmem [#allocation2], %s870_s6 }
  0x31   : > { %s180_s28 = sshll.u32 %s173_s25, 4  ;;  %p1411_p12 = pnand %p1018_p6, %p39_p8  ;;  %s1415_s28 = int_to_ptr.vmem [resolvable:$true] %s180_s28 }
  0x32   : > { %s1417_s10 = scalar_lea.sflag [#allocation3], %s169_s26  ;;  %s1112_s11 = scalar_lea.hbm %s1409_s9, 2048 }
  0x33   : > { %p1113_p13 = scmp.ne.s32.totalorder %s1409_s9, %s1112_s11  ;;  %p1114_p0 = pneg %p1411_p12 }
  0x34   : > { %s1117_s5 = scalar_lea.hbm %s1729_s0, 4096  ;;  %p1118_p7 = scmp.lt.u32.totalorder %s1409_s9, %s1729_s0 }
  0x35   : > { %p1115_p3 = pnand %p1114_p0, %p1113_p13  ;;  %p1119_p10 = scmp.lt.u32.totalorder %s1117_s5, %s1112_s11 }
  0x36   : > { %p1121_p2 = scmp.lt.u32.totalorder %s1112_s11, %s1409_s9 }
  0x37   : > { %p1116_p5 = pneg %p1115_p3  ;;  %p1120_p1 = por %p1119_p10, %p1118_p7 }
  0x39   : > { %p1122_p4 = por %p1121_p2, %p1120_p1 }
  0x3b   : > { %p1123_p6 = pnand %p1122_p4, %p1116_p5 }
  0x3d   : > { %1126 = shalt.err (!%p1123_p6)
}
  0x3e   : > { %s1127_s26 = scalar_lea.vmem %s1415_s28, 2048  ;;  %s1273_s8 = smov [#allocation2]  }
  0x3f   : > { %p1128_p8 = scmp.ne.s32.totalorder %s1415_s28, %s1127_s26  ;;  %s1132_s25 = sshll.u32 %s1273_s8, 4  ;;  %s1133_s25 = int_to_ptr.vmem [resolvable:$false] %s1132_s25 }
  0x40   : > { %s1134_s14 = scalar_lea.vmem %s1133_s25, 4096  ;;  %p1135_p3 = scmp.lt.s32.totalorder %s1415_s28, %s1133_s25 }
  0x41   : > { %p1130_p9 = pnand %p1128_p8, %p1114_p0  ;;  %p1136_p7 = scmp.lt.s32.totalorder %s1134_s14, %s1127_s26 }
  0x43   : > { %p1131_p13 = pneg %p1130_p9  ;;  %p1137_p10 = por %p1136_p7, %p1135_p3 }
  0x45   : > { %p1138_p1 = pnand %p1137_p10, %p1131_p13 }
  0x47   : > { %1141 = shalt.err (!%p1138_p1)
}
  0x48   : > { %1012 = dma.hbm_to_vmem [thread:$0]  (!%p1411_p12), %s1409_s9, 2048, %s1415_s28, %s1417_s10, %s1271_s12, %s1271_s12, %s1272_s13  }
  0x49   : > { %p1744_p0 = scmp.ne.s32.totalorder %s1739_s23, 0 }
  0x4a   : > { %s1451_s11 = sand.u32 (!%p1744_p0), 1, %s1260_s16   ;;  %p1745_p5 = scmp.ne.s32.totalorder (!%p1744_p0), %s1737_s21, 0 }
  0x4b   : > { %192 = sbr.rel (%p1744_p0) target bundleno = 449 (0x1c1), region = 28  ;;  %s874_s20 = sshll.u32 (!%p1744_p0), %s1451_s11, 7 }
  0x4c   : > { %s195_s5 = scalar_lea.sflag (!%p1744_p0), [#allocation3], %s1451_s11  ;;  %s1455_s6 = scalar_lea.vmem (!%p1744_p0), [#allocation2], %s874_s20 }
  0x52   : > { %1239 = dma.done.wait (%p1745_p5), %s195_s5, 2048  }
  0x53   : > { %1241 = vsyncadd (%p1745_p5), %s195_s5, 4294965248  ;;  %p1746_p12 = scmp.eq.s32.totalorder %s1326_s19, 0 }
  0x55   : > { %1243 = dma.done.wait (%p1746_p12), [#allocation6], 320   ;;  %p1747_p2 = pmov %p1746_p12 }
  0x56   : > { %s876_s23 = sshll.u32 %s1451_s11, 8  ;;  %p1748_p4 = scmp.ne.s32.totalorder %s1326_s19, 0 }
  0x57   : > { %1245 = vsyncadd (%p1747_p2), [#allocation6], 4294966976  ;;  %s1466_s12 = scalar_lea.vmem [#allocation7], %s876_s23  ;;  %v1274_v0 = vmov (!%p1748_p4), 0.0  }
  0x58   : > { %233 = sbr.rel (%p1748_p4) target bundleno = 95 (0x5f), region = 40  ;;  %234 = vst [vmem:[#allocation8] sm:$0x1] (!%p1748_p4), %v1274_v0  ;;  %235 = vst [vmem:[#allocation10] sm:$0x1] (!%p1748_p4), %v1274_v0 }
  0x5f PF: > { %v1065_v1 = vld [vmem:[#allocation5] sm:$0xff]   ;;  %v1066_v2 = vld [vmem:[#allocation5 + $0x8] sm:$0xff]   ;;  %vm368_vm0 = vcmask 293888   ;;  %v1067_v3 = vld [vmem:[#allocation5 + $0x10] ss:$0 sps:$4 sm:$0x33]  }
  0x60   : > { %943 = vmatprep.subr.bf16.mxu0 %v1065_v1  ;;  %v1068_v4 = vld [vmem:[%s1455_s6] sm:$0xff]   ;;  %981 = vmatprep.subr.bf16.mxu1 %v1065_v1  ;;  %vm417_vm1 = vcmask 1041408   ;;  %v1069_v6 = vld [vmem:[%s1455_s6 + $0x8] sm:$0xff]   ;;  %v1070_v7 = vld [vmem:[%s1455_s6 + $0x10] sm:$0xff]   ;;  %s923_s21 = sshll.u32 %s1326_s19, 12  ;;  %s740_s13 = sshll.u32 %s1466_s12, 4  ;;  %s1576_s13 = int_to_ptr.vmem [resolvable:$true] %s740_s13 }
  0x61   : > { %944 = vmatpush3.bf16.msra.mxu0 %v1065_v1  ;;  %984 = vmatpush3.bf16.msra.mxu1 %v1065_v1  ;;  %v419_v5 = vsel %vm417_vm1, %v1067_v3, 0  ;;  %v1076_v8 = vld [vmem:[%s1455_s6 + $0x40] sm:$0xff]   ;;  %v1077_v9 = vld [vmem:[%s1455_s6 + $0x48] sm:$0xff]   ;;  %v1078_v10 = vld [vmem:[%s1455_s6 + $0x50] sm:$0xff]   ;;  %s1574_s29 = scalar_lea.hbm %s1731_s2, %s923_s21  ;;  %s727_s10 = scalar_lea.sflag [#allocation4], %s1451_s11 }
  0x62   : > { %945 = vmatprep.subr.bf16.mxu0 %v1066_v2  ;;  %949 = vmatprep.mubr.msk.bf16.mxu0 %vm368_vm0, %v1068_v4  ;;  %v1071_v11 = vld [vmem:[%s1455_s6 + $0x18] sm:$0xff]   ;;  %v1072_v13 = vld [vmem:[%s1455_s6 + $0x20] sm:$0xff]   ;;  %v1073_v15 = vld [vmem:[%s1455_s6 + $0x28] sm:$0xff]   ;;  %s1142_s7 = scalar_lea.vmem %s1576_s13, 4096  ;;  %s1275_s26 = smov [#allocation7]  }
  0x63   : > { %982 = vmatprep.subr.bf16.mxu1 %v1066_v2  ;;  %965 = vmatprep.mubr.msk.bf16.mxu1 %vm368_vm0, %v1076_v8  ;;  %v1079_v12 = vld [vmem:[%s1455_s6 + $0x58] sm:$0xff]   ;;  %v1080_v14 = vld [vmem:[%s1455_s6 + $0x60] sm:$0xff]   ;;  %v1081_v16 = vld [vmem:[%s1455_s6 + $0x68] sm:$0xff]   ;;  %p1143_p6 = scmp.ne.s32.totalorder %s1576_s13, %s1142_s7  ;;  %s1146_s8 = sshll.u32 %s1275_s26, 4  ;;  %s1147_s8 = int_to_ptr.vmem [resolvable:$false] %s1146_s8 }
  0x64   : > { %v1074_v17 = vld [vmem:[%s1455_s6 + $0x30] sm:$0xff]   ;;  %v1075_v19 = vld [vmem:[%s1455_s6 + $0x38] sm:$0xff]   ;;  %s1148_s25 = scalar_lea.vmem %s1147_s8, 8192  ;;  %p1149_p13 = scmp.lt.s32.totalorder %s1576_s13, %s1147_s8 }
  0x65   : > { %946 = vmatpush3.bf16.msra.mxu0 %v1066_v2  ;;  %985 = vmatpush3.bf16.msra.mxu1 %v1066_v2  ;;  %v1082_v18 = vld [vmem:[%s1455_s6 + $0x70] sm:$0xff]   ;;  %v1083_v20 = vld [vmem:[%s1455_s6 + $0x78] sm:$0xff]   ;;  %p1144_p8 = pnand %p1143_p6, %p1400_p11  ;;  %p1150_p3 = scmp.lt.s32.totalorder %s1148_s25, %s1142_s7 }
  0x66   : > { %987 = vmatprep.subr.msk.bf16.mxu0 %vm417_vm1, %v1067_v3  ;;  %988 = vmatprep.subr.msk.bf16.mxu1 %vm417_vm1, %v1067_v3 }
  0x67   : > { %p1145_p9 = pneg %p1144_p8  ;;  %p1151_p7 = por %p1150_p3, %p1149_p13 }
  0x69   : > { %948 = vmatpush3.bf16.msra.mxu0 %v419_v5  ;;  %986 = vmatpush3.bf16.msra.mxu1 %v419_v5  ;;  %p1152_p10 = pnand %p1151_p7, %p1145_p9 }
  0x6c   : > { %950 = vmatmul.mubr.msk.bf16.vlgmr.msra.gmra.mrb[0].mxu0 %vm368_vm0, %v1069_v6  ;;  %966 = vmatmul.mubr.msk.bf16.vlgmr.msra.gmra.mrb[0].mxu1 %vm368_vm0, %v1077_v9 }
  0x6d   : > { %953 = vmatprep.mubr.msk.bf16.mxu0 %vm368_vm0, %v1070_v7  ;;  %969 = vmatprep.mubr.msk.bf16.mxu1 %vm368_vm0, %v1078_v10 }
  0x74   : > { %954 = vmatmul.mubr.msk.bf16.gmra.mrb[4].mxu0 %vm368_vm0, %v1071_v11  ;;  %970 = vmatmul.mubr.msk.bf16.gmra.mrb[4].mxu1 %vm368_vm0, %v1079_v12 }
  0x75   : > { %957 = vmatprep.mubr.msk.bf16.mxu0 %vm368_vm0, %v1072_v13  ;;  %973 = vmatprep.mubr.msk.bf16.mxu1 %vm368_vm0, %v1080_v14 }
  0x7c   : > { %958 = vmatmul.mubr.msk.bf16.gmra.mrb[8].mxu0 %vm368_vm0, %v1073_v15  ;;  %974 = vmatmul.mubr.msk.bf16.gmra.mrb[8].mxu1 %vm368_vm0, %v1081_v16 }
  0x7d   : > { %961 = vmatprep.mubr.msk.bf16.mxu0 %vm368_vm0, %v1074_v17  ;;  %977 = vmatprep.mubr.msk.bf16.mxu1 %vm368_vm0, %v1082_v18 }
  0x84   : > { %962 = vmatmul.mubr.msk.bf16.gmra.mrb[12].mxu0 %vm368_vm0, %v1075_v19  ;;  %978 = vmatmul.mubr.msk.bf16.gmra.mrb[12].mxu1 %vm368_vm0, %v1083_v20 }
 0x13f   : > { %v951_v21 = vpop.f32.mrb[0].mxu0  ;;  %v1502_v22 = vpop.f32.mrb[0].mxu1 }
 0x140   : > { %584 = vst [vmem:[%s1466_s12 + $0x10] sm:$0xff] %v951_v21  ;;  %v455_v23 = vpop.f32.mrb[1].mxu0  ;;  %600 = vst [vmem:[%s1466_s12 + $0x90] sm:$0xff] %v1502_v22  ;;  %v1507_v24 = vpop.f32.mrb[1].mxu1  ;;  %v657_v32 = vmul.f32 %v951_v21, %v951_v21 }
 0x141   : > { %582 = vst [vmem:[%s1466_s12] sm:$0xff] %v455_v23  ;;  %v952_v25 = vpop.f32.mrb[2].mxu0  ;;  %598 = vst [vmem:[%s1466_s12 + $0x80] sm:$0xff] %v1507_v24  ;;  %v1512_v26 = vpop.f32.mrb[2].mxu1  ;;  %v655_v29 = vmul.f32 %v455_v23, %v455_v23 }
 0x142   : > { %585 = vst [vmem:[%s1466_s12 + $0x18] sm:$0xff] %v952_v25  ;;  %v458_v27 = vpop.f32.mrb[3].mxu0  ;;  %601 = vst [vmem:[%s1466_s12 + $0x98] sm:$0xff] %v1512_v26  ;;  %v1517_v28 = vpop.f32.mrb[3].mxu1  ;;  %v658_v35 = vmul.f32 %v952_v25, %v952_v25 }
 0x143   : > { %583 = vst [vmem:[%s1466_s12 + $0x8] sm:$0xff] %v458_v27  ;;  %v615_v30 = vadd.f32 %v458_v27, %v455_v23  ;;  %v656_v31 = vmul.f32 %v458_v27, %v458_v27  ;;  %599 = vst [vmem:[%s1466_s12 + $0x88] sm:$0xff] %v1517_v28 }
 0x145   : > { %v616_v33 = vadd.f32 %v951_v21, %v615_v30  ;;  %v687_v34 = vadd.f32 %v656_v31, %v655_v29 }
 0x147   : > { %v688_v36 = vadd.f32 %v687_v34, %v657_v32  ;;  %v955_v37 = vpop.f32.mrb[4].mxu0  ;;  %v617_v38 = vadd.f32 %v952_v25, %v616_v33  ;;  %v1522_v39 = vpop.f32.mrb[4].mxu1 }
 0x148   : > { %588 = vst [vmem:[%s1466_s12 + $0x30] sm:$0xff] %v955_v37  ;;  %v471_v40 = vpop.f32.mrb[5].mxu0  ;;  %604 = vst [vmem:[%s1466_s12 + $0xb0] sm:$0xff] %v1522_v39  ;;  %v1527_v41 = vpop.f32.mrb[5].mxu1  ;;  %v661_v52 = vmul.f32 %v955_v37, %v955_v37 }
 0x149   : > { %586 = vst [vmem:[%s1466_s12 + $0x20] sm:$0xff] %v471_v40  ;;  %v618_v42 = vadd.f32 %v617_v38, %v471_v40  ;;  %v659_v43 = vmul.f32 %v471_v40, %v471_v40  ;;  %v689_v44 = vadd.f32 %v688_v36, %v658_v35  ;;  %v956_v45 = vpop.f32.mrb[6].mxu0  ;;  %602 = vst [vmem:[%s1466_s12 + $0xa0] sm:$0xff] %v1527_v41  ;;  %v1532_v46 = vpop.f32.mrb[6].mxu1 }
 0x14a   : > { %589 = vst [vmem:[%s1466_s12 + $0x38] sm:$0xff] %v956_v45  ;;  %v474_v47 = vpop.f32.mrb[7].mxu0  ;;  %605 = vst [vmem:[%s1466_s12 + $0xb8] sm:$0xff] %v1532_v46  ;;  %v1537_v48 = vpop.f32.mrb[7].mxu1  ;;  %v662_v55 = vmul.f32 %v956_v45, %v956_v45 }
 0x14b   : > { %v690_v49 = vadd.f32 %v689_v44, %v659_v43  ;;  %587 = vst [vmem:[%s1466_s12 + $0x28] sm:$0xff] %v474_v47  ;;  %v619_v50 = vadd.f32 %v618_v42, %v474_v47  ;;  %v660_v51 = vmul.f32 %v474_v47, %v474_v47  ;;  %603 = vst [vmem:[%s1466_s12 + $0xa8] sm:$0xff] %v1537_v48 }
 0x14d   : > { %v620_v53 = vadd.f32 %v955_v37, %v619_v50  ;;  %v691_v54 = vadd.f32 %v690_v49, %v660_v51 }
 0x14f   : > { %v692_v56 = vadd.f32 %v691_v54, %v661_v52  ;;  %v959_v57 = vpop.f32.mrb[8].mxu0  ;;  %v621_v58 = vadd.f32 %v956_v45, %v620_v53  ;;  %v1542_v59 = vpop.f32.mrb[8].mxu1 }
 0x150   : > { %592 = vst [vmem:[%s1466_s12 + $0x50] sm:$0xff] %v959_v57  ;;  %v487_v60 = vpop.f32.mrb[9].mxu0  ;;  %608 = vst [vmem:[%s1466_s12 + $0xd0] sm:$0xff] %v1542_v59  ;;  %v1547_v61 = vpop.f32.mrb[9].mxu1  ;;  %v665_v8 = vmul.f32 %v959_v57, %v959_v57 }
 0x151   : > { %590 = vst [vmem:[%s1466_s12 + $0x40] sm:$0xff] %v487_v60  ;;  %v622_v62 = vadd.f32 %v621_v58, %v487_v60  ;;  %v663_v63 = vmul.f32 %v487_v60, %v487_v60  ;;  %v693_v0 = vadd.f32 %v692_v56, %v662_v55  ;;  %v960_v1 = vpop.f32.mrb[10].mxu0  ;;  %606 = vst [vmem:[%s1466_s12 + $0xc0] sm:$0xff] %v1547_v61  ;;  %v1552_v2 = vpop.f32.mrb[10].mxu1 }
 0x152   : > { %593 = vst [vmem:[%s1466_s12 + $0x58] sm:$0xff] %v960_v1  ;;  %v490_v3 = vpop.f32.mrb[11].mxu0  ;;  %609 = vst [vmem:[%s1466_s12 + $0xd8] sm:$0xff] %v1552_v2  ;;  %v1557_v4 = vpop.f32.mrb[11].mxu1  ;;  %v666_v11 = vmul.f32 %v960_v1, %v960_v1 }
 0x153   : > { %v694_v5 = vadd.f32 %v693_v0, %v663_v63  ;;  %591 = vst [vmem:[%s1466_s12 + $0x48] sm:$0xff] %v490_v3  ;;  %v623_v6 = vadd.f32 %v622_v62, %v490_v3  ;;  %v664_v7 = vmul.f32 %v490_v3, %v490_v3  ;;  %607 = vst [vmem:[%s1466_s12 + $0xc8] sm:$0xff] %v1557_v4 }
 0x155   : > { %v624_v9 = vadd.f32 %v959_v57, %v623_v6  ;;  %v695_v10 = vadd.f32 %v694_v5, %v664_v7 }
 0x157   : > { %v696_v12 = vadd.f32 %v695_v10, %v665_v8  ;;  %v963_v13 = vpop.f32.mrb[12].mxu0  ;;  %v625_v14 = vadd.f32 %v960_v1, %v624_v9  ;;  %v1564_v15 = vpop.f32.mrb[12].mxu1 }
 0x158   : > { %596 = vst [vmem:[%s1466_s12 + $0x70] sm:$0xff] %v963_v13  ;;  %v503_v16 = vpop.f32.mrb[13].mxu0  ;;  %612 = vst [vmem:[%s1466_s12 + $0xf0] sm:$0xff] %v1564_v15  ;;  %v1569_v17 = vpop.f32.mrb[13].mxu1 }
 0x159   : > { %594 = vst [vmem:[%s1466_s12 + $0x60] sm:$0xff] %v503_v16  ;;  %v626_v18 = vadd.f32 %v625_v14, %v503_v16  ;;  %v667_v19 = vmul.f32 %v503_v16, %v503_v16  ;;  %v697_v20 = vadd.f32 %v696_v12, %v666_v11  ;;  %v964_v21 = vpop.f32.mrb[14].mxu0  ;;  %610 = vst [vmem:[%s1466_s12 + $0xe0] sm:$0xff] %v1569_v17  ;;  %v1581_v23 = vpop.f32.mrb[14].mxu1 }
 0x15a   : > { %597 = vst [vmem:[%s1466_s12 + $0x78] sm:$0xff] %v964_v21  ;;  %v506_v25 = vpop.f32.mrb[15].mxu0  ;;  %613 = vst [vmem:[%s1466_s12 + $0xf8] sm:$0xff] %v1581_v23  ;;  %v1586_v27 = vpop.f32.mrb[15].mxu1 }
 0x15b   : > { %v698_v29 = vadd.f32 %v697_v20, %v667_v19  ;;  %595 = vst [vmem:[%s1466_s12 + $0x68] sm:$0xff] %v506_v25  ;;  %v627_v30 = vadd.f32 %v626_v18, %v506_v25  ;;  %v668_v31 = vmul.f32 %v506_v25, %v506_v25  ;;  %611 = vst [vmem:[%s1466_s12 + $0xe8] sm:$0xff] %v1586_v27 }
 0x15c   : > { %1155 = shalt.err (!%p1152_p10)
}
 0x15d   : > { %s1156_s14 = scalar_lea.hbm %s1574_s29, 4096  ;;  %s1160_s6 = scalar_lea.hbm %s1731_s2, 8192 }
 0x15e   : > { %p1157_p1 = scmp.ne.s32.totalorder %s1574_s29, %s1156_s14  ;;  %p1161_p12 = scmp.lt.u32.totalorder %s1574_s29, %s1731_s2 }
 0x15f   : > { %p1162_p2 = scmp.lt.u32.totalorder %s1160_s6, %s1156_s14  ;;  %p1164_p6 = scmp.lt.u32.totalorder %s1156_s14, %s1574_s29 }
 0x160   : > { %p1158_p0 = pnand %p1157_p1, %p1400_p11 }
 0x161   : > { %p1163_p4 = por %p1162_p2, %p1161_p12 }
 0x162   : > { %p1159_p5 = pneg %p1158_p0 }
 0x163   : > { %p1165_p8 = por %p1164_p6, %p1163_p4 }
 0x165   : > { %p1166_p9 = pnand %p1165_p8, %p1159_p5 }
 0x167   : > { %1169 = shalt.err (!%p1166_p9)
}
 0x168   : > { %s1276_s21 = smov 128   ;;  %s1277_s9 = smov 8   ;;  %v669_v32 = vmul.f32 %v963_v13, %v963_v13  ;;  %v628_v33 = vadd.f32 %v963_v13, %v627_v30  ;;  %v699_v34 = vadd.f32 %v698_v29, %v668_v31  ;;  %v670_v35 = vmul.f32 %v964_v21, %v964_v21 }
 0x169   : > { %995 = dma.vmem_to_hbm [thread:$0]  (%p1400_p11), %s1576_s13, 4096, %s1574_s29, %s727_s10, %s1276_s21, %s1276_s21, %s1277_s9   ;;  %v671_v38 = vmul.f32 %v1507_v24, %v1507_v24  ;;  %v672_v45 = vmul.f32 %v1517_v28, %v1517_v28  ;;  %v673_v47 = vmul.f32 %v1502_v22, %v1502_v22  ;;  %v674_v51 = vmul.f32 %v1512_v26, %v1512_v26 }
 0x16a   : > { %v700_v36 = vadd.f32 %v699_v34, %v669_v32  ;;  %v629_v37 = vadd.f32 %v964_v21, %v628_v33  ;;  %v676_v57 = vmul.f32 %v1537_v48, %v1537_v48  ;;  %v680_v5 = vmul.f32 %v1557_v4, %v1557_v4  ;;  %v614_v34 = vld [vmem:[#allocation8] sm:$0x1]  ;;  %s1278_s30 = smov [#allocation8]   ;;  %s1279_s13 = smov [#allocation10]  }
 0x16b   : > { %v684_v13 = vmul.f32 %v1586_v27, %v1586_v27  ;;  %s754_s11 = sshll.u32 %s1278_s30, 4  ;;  %s765_s28 = sshll.u32 %s1279_s13, 4  ;;  %s755_s11 = int_to_ptr.vmem [resolvable:$true] %s754_s11  ;;  %s1663_s28 = int_to_ptr.vmem [resolvable:$true] %s765_s28 }
 0x16c   : > { %v630_v40 = vadd.f32 %v629_v37, %v1507_v24  ;;  %v701_v42 = vadd.f32 %v700_v36, %v670_v35  ;;  %v675_v24 = vmul.f32 %v1527_v41, %v1527_v41  ;;  %v654_v36 = vld [vmem:[#allocation10] sm:$0x1]  ;;  %s1170_s29 = scalar_lea.vmem %s755_s11, 16  ;;  %p1749_p13 = scmp.eq.s32.totalorder %s1326_s19, 1 }
 0x16d   : > { %p1171_p11 = scmp.ne.s32.totalorder %s755_s11, %s1170_s29  ;;  %s1176_s10 = scalar_lea.vmem %s755_s11, 32 }
 0x16e   : > { %v702_v43 = vadd.f32 %v701_v42, %v671_v38  ;;  %v631_v44 = vadd.f32 %v630_v40, %v1517_v28  ;;  %p1177_p10 = scmp.lt.s32.totalorder %s755_s11, %s755_s11  ;;  %p1178_p1 = scmp.lt.s32.totalorder %s1176_s10, %s1170_s29 }
 0x16f   : > { %p1172_p3 = pnand %p1171_p11, %p1749_p13 }
 0x170   : > { %v632_v49 = vadd.f32 %v1502_v22, %v631_v44  ;;  %v703_v50 = vadd.f32 %v702_v43, %v672_v45  ;;  %v677_v22 = vmul.f32 %v1522_v39, %v1522_v39  ;;  %p1179_p0 = por %p1178_p1, %p1177_p10 }
 0x171   : > { %p1173_p7 = pneg %p1172_p3 }
 0x172   : > { %v704_v52 = vadd.f32 %v703_v50, %v673_v47  ;;  %v633_v53 = vadd.f32 %v1512_v26, %v632_v49  ;;  %v678_v26 = vmul.f32 %v1532_v46, %v1532_v46 }
 0x173   : > { %p1180_p5 = pnand %p1179_p0, %p1173_p7 }
 0x174   : > { %v634_v54 = vadd.f32 %v633_v53, %v1527_v41  ;;  %v705_v55 = vadd.f32 %v704_v52, %v674_v51  ;;  %v679_v41 = vmul.f32 %v1547_v61, %v1547_v61 }
 0x176   : > { %v706_v56 = vadd.f32 %v705_v55, %v675_v24  ;;  %v635_v28 = vadd.f32 %v634_v54, %v1537_v48 }
 0x178   : > { %v636_v58 = vadd.f32 %v1522_v39, %v635_v28  ;;  %v707_v60 = vadd.f32 %v706_v56, %v676_v57  ;;  %v681_v39 = vmul.f32 %v1542_v59, %v1542_v59 }
 0x17a   : > { %v708_v62 = vadd.f32 %v707_v60, %v677_v22  ;;  %v637_v63 = vadd.f32 %v1532_v46, %v636_v58  ;;  %v682_v46 = vmul.f32 %v1552_v2, %v1552_v2 }
 0x17c   : > { %v638_v0 = vadd.f32 %v637_v63, %v1547_v61  ;;  %v709_v1 = vadd.f32 %v708_v62, %v678_v26  ;;  %v683_v61 = vmul.f32 %v1569_v17, %v1569_v17 }
 0x17e   : > { %v710_v3 = vadd.f32 %v709_v1, %v679_v41  ;;  %v639_v48 = vadd.f32 %v638_v0, %v1557_v4 }
 0x180   : > { %v640_v6 = vadd.f32 %v1542_v59, %v639_v48  ;;  %v711_v7 = vadd.f32 %v710_v3, %v680_v5  ;;  %v685_v59 = vmul.f32 %v1564_v15, %v1564_v15 }
 0x182   : > { %v712_v8 = vadd.f32 %v711_v7, %v681_v39  ;;  %v641_v9 = vadd.f32 %v1552_v2, %v640_v6  ;;  %v686_v2 = vmul.f32 %v1581_v23, %v1581_v23 }
 0x184   : > { %v642_v10 = vadd.f32 %v641_v9, %v1569_v17  ;;  %v713_v11 = vadd.f32 %v712_v8, %v682_v46 }
 0x186   : > { %v714_v12 = vadd.f32 %v713_v11, %v683_v61  ;;  %v643_v4 = vadd.f32 %v642_v10, %v1586_v27 }
 0x188   : > { %v644_v14 = vadd.f32 %v1564_v15, %v643_v4  ;;  %v715_v16 = vadd.f32 %v714_v12, %v684_v13 }
 0x18a   : > { %v645_v18 = vadd.f32 %v1581_v23, %v644_v14  ;;  %v716_v19 = vadd.f32 %v715_v16, %v685_v59 }
 0x18c   : > { %v646_v17 = vrot.slane %v645_v18, 4  ;;  %v717_v20 = vadd.f32 %v716_v19, %v686_v2 }
 0x18e   : > { %v647_v21 = vadd.f32 %v646_v17, %v645_v18  ;;  %v718_v25 = vrot.slane %v717_v20, 4 }
 0x190   : > { %v648_v29 = vrot.slane %v647_v21, 2  ;;  %v719_v30 = vadd.f32 %v718_v25, %v717_v20 }
 0x192   : > { %v649_v31 = vadd.f32 %v648_v29, %v647_v21  ;;  %v720_v27 = vrot.slane %v719_v30, 2 }
 0x194   : > { %v650_v32 = vrot.slane %v649_v31, 1  ;;  %v721_v33 = vadd.f32 %v720_v27, %v719_v30 }
 0x196   : > { %v651_v15 = vadd.f32 %v650_v32, %v649_v31  ;;  %v722_v35 = vrot.slane %v721_v33, 1 }
 0x198   : > { %v652_v23 = vadd.f32 %v651_v15, %v614_v34  ;;  %v723_v37 = vadd.f32 %v722_v35, %v721_v33 }
 0x19a   : > { %653 = vst [vmem:[#allocation8] sm:$0x1] %v652_v23  ;;  %v724_v38 = vadd.f32 %v723_v37, %v654_v36 }
 0x19b   : > { %1183 = shalt.err (!%p1180_p5)
}
 0x19c   : > { %s1184_s8 = scalar_lea.hbm %s1732_s3, 16  ;;  %p1750_p2 = pmov %p1749_p13 }
 0x19d   : > { %p1185_p12 = scmp.ne.s32.totalorder %s1732_s3, %s1184_s8  ;;  %p1190_p8 = scmp.lt.u32.totalorder %s1184_s8, %s1732_s3 }
 0x19f   : > { %p1186_p4 = pnand %p1185_p12, %p1750_p2 }
 0x1a1   : > { %p1187_p6 = pneg %p1186_p4 }
 0x1a3   : > { %p1192_p9 = pnand %p1190_p8, %p1187_p6 }
 0x1a5   : > { %1195 = shalt.err (!%p1192_p9)
}
 0x1a6   : > { %p1751_p11 = pmov %p1750_p2  ;;  %725 = vst [vmem:[#allocation10] sm:$0x1] %v724_v38  ;;  %s1196_s12 = scalar_lea.vmem %s1663_s28, 16 }
 0x1a7   : > { %p1197_p13 = scmp.ne.s32.totalorder %s1663_s28, %s1196_s12  ;;  %p1752_p3 = pmov %p1750_p2 }
 0x1a8   : > { %997 = dma.vmem_to_hbm [thread:$0]  (%p1751_p11), %s755_s11, 16, %s1732_s3, [#allocation9]  }
 0x1a9   : > { %p1198_p7 = pnand %p1197_p13, %p1752_p3  ;;  %s1202_s21 = scalar_lea.vmem %s1663_s28, 32 }
 0x1aa   : > { %p1203_p1 = scmp.lt.s32.totalorder %s1663_s28, %s1663_s28  ;;  %p1204_p0 = scmp.lt.s32.totalorder %s1202_s21, %s1196_s12 }
 0x1ab   : > { %p1199_p10 = pneg %p1198_p7 }
 0x1ac   : > { %p1205_p5 = por %p1204_p0, %p1203_p1 }
 0x1ae   : > { %p1206_p12 = pnand %p1205_p5, %p1199_p10 }
 0x1b0   : > { %1209 = shalt.err (!%p1206_p12)
}
 0x1b1   : > { %s1210_s13 = scalar_lea.hbm %s1733_s4, 16  ;;  %p1753_p4 = pmov %p1752_p3 }
 0x1b2   : > { %p1211_p2 = scmp.ne.s32.totalorder %s1733_s4, %s1210_s13  ;;  %p1216_p9 = scmp.lt.u32.totalorder %s1210_s13, %s1733_s4 }
 0x1b4   : > { %p1212_p6 = pnand %p1211_p2, %p1753_p4 }
 0x1b6   : > { %p1213_p8 = pneg %p1212_p6 }
 0x1b8   : > { %p1218_p11 = pnand %p1216_p9, %p1213_p8 }
 0x1ba   : > { %1221 = shalt.err (!%p1218_p11)
}
 0x1bb   : > { %p1754_p13 = pmov %p1752_p3 }
 0x1bd   : > { %999 = dma.vmem_to_hbm [thread:$0]  (%p1754_p13), %s1663_s28, 16, %s1733_s4, [#allocation9]  }
 0x1be   : > { %1247 = dma.done.wait (%p1752_p3), [#allocation9], 32   ;;  %p1755_p7 = pmov %p1752_p3 }
 0x1c0   : > { %1249 = vsyncadd (%p1755_p7), [#allocation9], 4294967264 }
 0x1c1 PF: > { %s785_s25 = sand.u32 1, %s1256_s15   ;;  %p1756_p10 = scmp.ne.s32.totalorder %s1738_s22, 0 }
 0x1c2   : > { %p1757_p1 = scmp.ge.s32.totalorder %s1268_s18, 2  ;;  %s786_s14 = scalar_lea.sflag [#allocation4], %s785_s25 }
 0x1c4   : > { %p1014_p0 = pnand %p1757_p1, %p1756_p10 }
 0x1c6   : > { %1251 = dma.done.wait (!%p1014_p0), %s786_s14, 4096  }
 0x1c7   : > { %1253 = vsyncadd (!%p1014_p0), %s786_s14, 4294963200  ;;  %p20_p5 = scmp.ge.s32.totalorder %s1362_s27, 4   ;;  %s1758_s15 = smov %s1260_s16 }
 0x1c8   : > { %s1759_s16 = smov %s1264_s17  ;;  %s1760_s17 = smov %s1396_s24 }
 0x1c9   : > { %s1761_s18 = smov %s1362_s27  ;;  %22 = sbr.rel (!%p20_p5) target bundleno = 7 (0x7), region = 97 }
 0x1d0   :  { %791 = vsyncpa [#allocation3], 1 }
 0x1d1   :  { %793 = vsyncpa [#allocation3 + $0x1], 1 }
 0x1d2   :  { %794 = vsyncpa [#allocation6], 1 }
 0x1d3   :  { %795 = vsyncpa [#allocation4], 1 }
 0x1d4   :  { %797 = vsyncpa [#allocation4 + $0x1], 1 }
 0x1d5   :  { %798 = vsyncpa [#allocation9], 1 }

// kernel: vgg_block.6
= control target key start
LH: loop header
LB: loop body
LE: loop exit
PB: predicated region body
PF: predicated region fallthrough
CT: control target
= control target key end

     0   :  { %10 = vsyncpa [#allocation3], 0  ;;  %s1759_s0 = inlined_call_operand.hbm [shape: bf16[512,72], index: 0, kind: input, shape index: {}]   ;;  %s1760_s1 = inlined_call_operand.hbm [shape: bf16[72,128], index: 1, kind: input, shape index: {}]   ;;  %s1761_s2 = inlined_call_operand.hbm [shape: f32[512,128], index: 2, kind: output, shape index: {0}]   ;;  %s1762_s3 = inlined_call_operand.hbm [shape: f32[1,128], index: 3, kind: output, shape index: {1}]   ;;  %s1763_s4 = inlined_call_operand.hbm [shape: f32[1,128], index: 4, kind: output, shape index: {2}]  }
   0x1   :  { %12 = vsyncpa [#allocation3 + $0x1], 0 }
   0x2   :  { %13 = vsyncpa [#allocation6], 0 }
   0x3   :  { %14 = vsyncpa [#allocation4], 0 }
   0x4   :  { %16 = vsyncpa [#allocation4 + $0x1], 0 }
   0x5   :  { %17 = vsyncpa [#allocation9], 0  ;;  %s1335_s15 = smov 0   ;;  %s1337_s16 = smov 0  }
   0x6   :  { %s1339_s17 = smov 0   ;;  %s1341_s18 = smov 0  }
   0x7 LB: > { %s1356_s19 = sadd.s32 4294967295, %s1298_s18   ;;  %s882_s20 = sadd.s32 4294967294, %s1298_s18   ;;  %s1298_s18 = sphi %s1341_s18, %s1791_s18   ;;  %s1294_s17 = sphi %s1339_s17, %s1790_s17   ;;  %s1290_s16 = sphi %s1337_s16, %s1789_s16   ;;  %s1286_s15 = sphi %s1335_s15, %s1788_s15  }
   0x8   : > { %p43_p0 = scmp.ne.s32.totalorder %s1290_s16, %s1286_s15  ;;  %p1764_p1 = scmp.eq.s32.totalorder %s1356_s19, 0 }
   0x9   : > { %p94_p3 = scmp.eq.s32.totalorder %s882_s20, 1  ;;  %p883_p5 = scmp.ge.s32.totalorder %s1298_s18, 1 }
   0xa   : > { %p1365_p4 = por %p1764_p1, %p43_p0  ;;  %p143_p7 = scmp.lt.s32.totalorder %s1298_s18, 3 }
   0xb   : > { %p1370_p6 = por %p94_p3, %p43_p0  ;;  %s1300_s24 = smov [#allocation5]  }
   0xc   : > { %s1767_s21 = scalar_select %p1365_p4, 1, 0 }
   0xd   : > { %s1768_s22 = scalar_select %p1370_p6, 1, 0 }
   0xe   : > { %p1376_p9 = pnand %p883_p5, %p143_p7  ;;  %s155_s25 = sshll.u32 %s1300_s24, 4  ;;  %s1380_s25 = int_to_ptr.vmem [resolvable:$true] %s155_s25 }
   0xf   : > { %s1392_s27 = sadd.s32 1, %s1298_s18   ;;  %s30_s28 = sadd.s32 1, %s1294_s17 }
  0x10   : > { %s1769_s23 = scalar_select %p1376_p9, 1, 0 }
  0x11   : > { %p1033_p10 = pneg %p1376_p9  ;;  %s27_s29 = ssub.s32 %s1298_s18, %s1392_s27 }
  0x12   : > { %s1114_s6 = scalar_lea.hbm %s1760_s1, 576 }
  0x13   : > { %p1387_p12 = pnand %p1033_p10, %p1764_p1  ;;  %p1115_p13 = scmp.ne.s32.totalorder %s1760_s1, %s1114_s6 }
  0x14   : > { %p1121_p7 = scmp.lt.u32.totalorder %s1114_s6, %s1760_s1 }
  0x15   : > { %p1116_p0 = pneg %p1387_p12 }
  0x17   : > { %p1117_p3 = pnand %p1116_p0, %p1115_p13 }
  0x19   : > { %p1118_p5 = pneg %p1117_p3 }
  0x1b   : > { %p1123_p10 = pnand %p1121_p7, %p1118_p5 }
  0x1d   : > { %1126 = shalt.err (!%p1123_p10)
}
  0x1e   : > { %s1127_s11 = scalar_lea.vmem %s1380_s25, 576  ;;  %p1135_p2 = scmp.lt.s32.totalorder %s1380_s25, %s1380_s25 }
  0x1f   : > { %p1128_p11 = scmp.ne.s32.totalorder %s1380_s25, %s1127_s11  ;;  %p1136_p6 = scmp.lt.s32.totalorder %s1127_s11, %s1127_s11 }
  0x21   : > { %p1130_p8 = pnand %p1128_p11, %p1116_p0  ;;  %p1137_p4 = por %p1136_p6, %p1135_p2 }
  0x23   : > { %p1131_p1 = pneg %p1130_p8 }
  0x25   : > { %p1138_p9 = pnand %p1137_p4, %p1131_p1 }
  0x27   : > { %1141 = shalt.err (!%p1138_p9)
}
  0x28   : > { %s1301_s12 = smov 64   ;;  %s1302_s13 = smov 4  }
  0x29   : > { %1036 = dma.hbm_to_vmem [thread:$0]  (!%p1387_p12), %s1760_s1, 576, %s1380_s25, [#allocation6], %s1301_s12, %s1301_s12, %s1302_s13  }
  0x2a   : > { %p28_p1 = scmp.eq.s32.totalorder %s27_s29, 0  ;;  %p37_p2 = scmp.ne.s32.totalorder %s1294_s17, %s1290_s16 }
  0x2b   : > { %p38_p4 = scmp.eq.s32.totalorder %s1298_s18, 0  ;;  %p1046_p6 = scmp.lt.s32.totalorder %s1298_s18, 2 }
  0x2c   : > { %s1426_s24 = scalar_select %p28_p1, %s1294_s17, %s30_s28  }
  0x2d   : > { %p39_p8 = por %p38_p4, %p37_p2  ;;  %p1771_p9 = scmp.eq.s32.totalorder %s1356_s19, 1 }
  0x2e   : > { %s169_s26 = sand.u32 1, %s1294_s17   ;;  %s940_s5 = sshll.u32 %s1298_s18, 11 }
  0x2f   : > { %p1430_p11 = por %p1771_p9, %p37_p2  ;;  %s886_s6 = sshll.u32 %s169_s26, 7 }
  0x30   : > { %s1439_s9 = scalar_lea.hbm %s1759_s0, %s940_s5  ;;  %s173_s25 = scalar_lea.vmem [#allocation2], %s886_s6 }
  0x31   : > { %s180_s28 = sshll.u32 %s173_s25, 4  ;;  %p1441_p12 = pnand %p1046_p6, %p39_p8  ;;  %s1445_s28 = int_to_ptr.vmem [resolvable:$true] %s180_s28 }
  0x32   : > { %s1447_s10 = scalar_lea.sflag [#allocation3], %s169_s26  ;;  %s1142_s11 = scalar_lea.hbm %s1439_s9, 2048 }
  0x33   : > { %p1143_p13 = scmp.ne.s32.totalorder %s1439_s9, %s1142_s11  ;;  %p1144_p0 = pneg %p1441_p12 }
  0x34   : > { %s1147_s5 = scalar_lea.hbm %s1759_s0, 4096  ;;  %p1148_p7 = scmp.lt.u32.totalorder %s1439_s9, %s1759_s0 }
  0x35   : > { %p1145_p3 = pnand %p1144_p0, %p1143_p13  ;;  %p1149_p10 = scmp.lt.u32.totalorder %s1147_s5, %s1142_s11 }
  0x36   : > { %p1151_p2 = scmp.lt.u32.totalorder %s1142_s11, %s1439_s9 }
  0x37   : > { %p1146_p5 = pneg %p1145_p3  ;;  %p1150_p1 = por %p1149_p10, %p1148_p7 }
  0x39   : > { %p1152_p4 = por %p1151_p2, %p1150_p1 }
  0x3b   : > { %p1153_p6 = pnand %p1152_p4, %p1146_p5 }
  0x3d   : > { %1156 = shalt.err (!%p1153_p6)
}
  0x3e   : > { %s1157_s26 = scalar_lea.vmem %s1445_s28, 2048  ;;  %s1303_s8 = smov [#allocation2]  }
  0x3f   : > { %p1158_p8 = scmp.ne.s32.totalorder %s1445_s28, %s1157_s26  ;;  %s1162_s25 = sshll.u32 %s1303_s8, 4  ;;  %s1163_s25 = int_to_ptr.vmem [resolvable:$false] %s1162_s25 }
  0x40   : > { %s1164_s14 = scalar_lea.vmem %s1163_s25, 4096  ;;  %p1165_p3 = scmp.lt.s32.totalorder %s1445_s28, %s1163_s25 }
  0x41   : > { %p1160_p9 = pnand %p1158_p8, %p1144_p0  ;;  %p1166_p7 = scmp.lt.s32.totalorder %s1164_s14, %s1157_s26 }
  0x43   : > { %p1161_p13 = pneg %p1160_p9  ;;  %p1167_p10 = por %p1166_p7, %p1165_p3 }
  0x45   : > { %p1168_p1 = pnand %p1167_p10, %p1161_p13 }
  0x47   : > { %1171 = shalt.err (!%p1168_p1)
}
  0x48   : > { %1040 = dma.hbm_to_vmem [thread:$0]  (!%p1441_p12), %s1439_s9, 2048, %s1445_s28, %s1447_s10, %s1301_s12, %s1301_s12, %s1302_s13  }
  0x49   : > { %p1774_p0 = scmp.ne.s32.totalorder %s1769_s23, 0 }
  0x4a   : > { %s1481_s11 = sand.u32 (!%p1774_p0), 1, %s1290_s16   ;;  %p1775_p5 = scmp.ne.s32.totalorder (!%p1774_p0), %s1767_s21, 0 }
  0x4b   : > { %192 = sbr.rel (%p1774_p0) target bundleno = 457 (0x1c9), region = 28  ;;  %s890_s20 = sshll.u32 (!%p1774_p0), %s1481_s11, 7 }
  0x4c   : > { %s195_s5 = scalar_lea.sflag (!%p1774_p0), [#allocation3], %s1481_s11  ;;  %s1485_s6 = scalar_lea.vmem (!%p1774_p0), [#allocation2], %s890_s20 }
  0x52   : > { %1269 = dma.done.wait (%p1775_p5), %s195_s5, 2048  }
  0x53   : > { %1271 = vsyncadd (%p1775_p5), %s195_s5, 4294965248  ;;  %p1776_p12 = scmp.eq.s32.totalorder %s1356_s19, 0 }
  0x55   : > { %1273 = dma.done.wait (%p1776_p12), [#allocation6], 576   ;;  %p1777_p2 = pmov %p1776_p12 }
  0x56   : > { %s892_s23 = sshll.u32 %s1481_s11, 8  ;;  %p1778_p4 = scmp.ne.s32.totalorder %s1356_s19, 0 }
  0x57   : > { %1275 = vsyncadd (%p1777_p2), [#allocation6], 4294966720  ;;  %s1496_s12 = scalar_lea.vmem [#allocation7], %s892_s23  ;;  %v1304_v0 = vmov (!%p1778_p4), 0.0  }
  0x58   : > { %233 = sbr.rel (%p1778_p4) target bundleno = 95 (0x5f), region = 40  ;;  %234 = vst [vmem:[#allocation8] sm:$0x1] (!%p1778_p4), %v1304_v0  ;;  %235 = vst [vmem:[#allocation10] sm:$0x1] (!%p1778_p4), %v1304_v0 }
  0x5f PF: > { %v1093_v1 = vld [vmem:[#allocation5] sm:$0xff]   ;;  %v1094_v2 = vld [vmem:[#allocation5 + $0x8] sm:$0xff]   ;;  %v1095_v3 = vld [vmem:[#allocation5 + $0x10] sm:$0xff]   ;;  %vm384_vm0 = vcmask 588800   ;;  %vm433_vm1 = vcmask 1043456   ;;  %s941_s21 = sshll.u32 %s1356_s19, 12 }
  0x60   : > { %963 = vmatprep.subr.bf16.mxu0 %v1093_v1  ;;  %1005 = vmatprep.subr.bf16.mxu1 %v1093_v1  ;;  %v1098_v4 = vld [vmem:[%s1485_s6] sm:$0xff]   ;;  %v1096_v5 = vld [vmem:[#allocation5 + $0x18] sm:$0xff]   ;;  %v1099_v9 = vld [vmem:[%s1485_s6 + $0x8] sm:$0xff]   ;;  %s756_s13 = sshll.u32 %s1496_s12, 4  ;;  %s1605_s29 = scalar_lea.hbm %s1761_s2, %s941_s21  ;;  %s1607_s13 = int_to_ptr.vmem [resolvable:$true] %s756_s13 }
  0x61   : > { %964 = vmatpush3.bf16.msra.mxu0 %v1093_v1  ;;  %1010 = vmatpush3.bf16.msra.mxu1 %v1093_v1  ;;  %v1097_v6 = vld [vmem:[#allocation5 + $0x20] ss:$0 sps:$4 sm:$0xff]   ;;  %v1100_v10 = vld [vmem:[%s1485_s6 + $0x10] sm:$0xff]   ;;  %v1107_v11 = vld [vmem:[%s1485_s6 + $0x48] sm:$0xff]   ;;  %s743_s10 = scalar_lea.sflag [#allocation4], %s1481_s11  ;;  %s1172_s7 = scalar_lea.vmem %s1607_s13, 4096 }
  0x62   : > { %965 = vmatprep.subr.bf16.mxu0 %v1094_v2  ;;  %1006 = vmatprep.subr.bf16.mxu1 %v1094_v2  ;;  %v1106_v7 = vld [vmem:[%s1485_s6 + $0x40] sm:$0xff]   ;;  %v435_v8 = vsel %vm433_vm1, %v1097_v6, 0  ;;  %v1108_v12 = vld [vmem:[%s1485_s6 + $0x50] sm:$0xff]   ;;  %v1101_v13 = vld [vmem:[%s1485_s6 + $0x18] sm:$0xff]   ;;  %p1173_p6 = scmp.ne.s32.totalorder %s1607_s13, %s1172_s7  ;;  %s1305_s26 = smov [#allocation7]  }
  0x63   : > { %973 = vmatprep.mubr.msk.bf16.mxu0 %vm384_vm0, %v1098_v4  ;;  %989 = vmatprep.mubr.msk.bf16.mxu1 %vm384_vm0, %v1106_v7  ;;  %v1102_v14 = vld [vmem:[%s1485_s6 + $0x20] sm:$0xff]   ;;  %v1109_v15 = vld [vmem:[%s1485_s6 + $0x58] sm:$0xff]   ;;  %v1103_v17 = vld [vmem:[%s1485_s6 + $0x28] sm:$0xff]   ;;  %s1176_s8 = sshll.u32 %s1305_s26, 4  ;;  %s1177_s8 = int_to_ptr.vmem [resolvable:$false] %s1176_s8 }
  0x64   : > { %v1110_v16 = vld [vmem:[%s1485_s6 + $0x60] sm:$0xff]   ;;  %v1104_v18 = vld [vmem:[%s1485_s6 + $0x30] sm:$0xff]   ;;  %v1111_v19 = vld [vmem:[%s1485_s6 + $0x68] sm:$0xff]   ;;  %p1174_p8 = pnand %p1173_p6, %p1430_p11  ;;  %s1178_s25 = scalar_lea.vmem %s1177_s8, 8192 }
  0x65   : > { %966 = vmatpush3.bf16.msra.mxu0 %v1094_v2  ;;  %1011 = vmatpush3.bf16.msra.mxu1 %v1094_v2  ;;  %v1112_v20 = vld [vmem:[%s1485_s6 + $0x70] sm:$0xff]   ;;  %v1105_v21 = vld [vmem:[%s1485_s6 + $0x38] sm:$0xff]   ;;  %p1179_p13 = scmp.lt.s32.totalorder %s1607_s13, %s1177_s8  ;;  %p1180_p3 = scmp.lt.s32.totalorder %s1178_s25, %s1172_s7 }
  0x66   : > { %967 = vmatprep.subr.bf16.mxu0 %v1095_v3  ;;  %1007 = vmatprep.subr.bf16.mxu1 %v1095_v3  ;;  %v1113_v22 = vld [vmem:[%s1485_s6 + $0x78] sm:$0xff]   ;;  %p1175_p9 = pneg %p1174_p8 }
  0x67   : > { %p1181_p7 = por %p1180_p3, %p1179_p13 }
  0x69   : > { %968 = vmatpush3.bf16.msra.mxu0 %v1095_v3  ;;  %1012 = vmatpush3.bf16.msra.mxu1 %v1095_v3  ;;  %p1182_p10 = pnand %p1181_p7, %p1175_p9 }
  0x6a   : > { %969 = vmatprep.subr.bf16.mxu0 %v1096_v5  ;;  %1008 = vmatprep.subr.bf16.mxu1 %v1096_v5 }
  0x6d   : > { %970 = vmatpush3.bf16.msra.mxu0 %v1096_v5  ;;  %1013 = vmatpush3.bf16.msra.mxu1 %v1096_v5 }
  0x6e   : > { %1015 = vmatprep.subr.msk.bf16.mxu0 %vm433_vm1, %v1097_v6  ;;  %1016 = vmatprep.subr.msk.bf16.mxu1 %vm433_vm1, %v1097_v6 }
  0x71   : > { %972 = vmatpush3.bf16.msra.mxu0 %v435_v8  ;;  %1014 = vmatpush3.bf16.msra.mxu1 %v435_v8 }
  0x74   : > { %974 = vmatmul.mubr.msk.bf16.vlgmr.msra.gmra.mrb[0].mxu0 %vm384_vm0, %v1099_v9  ;;  %990 = vmatmul.mubr.msk.bf16.vlgmr.msra.gmra.mrb[0].mxu1 %vm384_vm0, %v1107_v11 }
  0x75   : > { %977 = vmatprep.mubr.msk.bf16.mxu0 %vm384_vm0, %v1100_v10  ;;  %993 = vmatprep.mubr.msk.bf16.mxu1 %vm384_vm0, %v1108_v12 }
  0x7c   : > { %978 = vmatmul.mubr.msk.bf16.gmra.mrb[4].mxu0 %vm384_vm0, %v1101_v13  ;;  %994 = vmatmul.mubr.msk.bf16.gmra.mrb[4].mxu1 %vm384_vm0, %v1109_v15 }
  0x7d   : > { %981 = vmatprep.mubr.msk.bf16.mxu0 %vm384_vm0, %v1102_v14  ;;  %997 = vmatprep.mubr.msk.bf16.mxu1 %vm384_vm0, %v1110_v16 }
  0x84   : > { %982 = vmatmul.mubr.msk.bf16.gmra.mrb[8].mxu0 %vm384_vm0, %v1103_v17  ;;  %998 = vmatmul.mubr.msk.bf16.gmra.mrb[8].mxu1 %vm384_vm0, %v1111_v19 }
  0x85   : > { %985 = vmatprep.mubr.msk.bf16.mxu0 %vm384_vm0, %v1104_v18  ;;  %1001 = vmatprep.mubr.msk.bf16.mxu1 %vm384_vm0, %v1112_v20 }
  0x8c   : > { %986 = vmatmul.mubr.msk.bf16.gmra.mrb[12].mxu0 %vm384_vm0, %v1105_v21  ;;  %1002 = vmatmul.mubr.msk.bf16.gmra.mrb[12].mxu1 %vm384_vm0, %v1113_v22 }
 0x147   : > { %v975_v23 = vpop.f32.mrb[0].mxu0  ;;  %v1533_v25 = vpop.f32.mrb[0].mxu1 }
 0x148   : > { %600 = vst [vmem:[%s1496_s12 + $0x10] sm:$0xff] %v975_v23  ;;  %v471_v24 = vpop.f32.mrb[1].mxu0  ;;  %616 = vst [vmem:[%s1496_s12 + $0x90] sm:$0xff] %v1533_v25  ;;  %v1538_v27 = vpop.f32.mrb[1].mxu1  ;;  %v673_v34 = vmul.f32 %v975_v23, %v975_v23 }
 0x149   : > { %598 = vst [vmem:[%s1496_s12] sm:$0xff] %v471_v24  ;;  %v976_v26 = vpop.f32.mrb[2].mxu0  ;;  %614 = vst [vmem:[%s1496_s12 + $0x80] sm:$0xff] %v1538_v27  ;;  %v1543_v29 = vpop.f32.mrb[2].mxu1  ;;  %v671_v30 = vmul.f32 %v471_v24, %v471_v24 }
 0x14a   : > { %601 = vst [vmem:[%s1496_s12 + $0x18] sm:$0xff] %v976_v26  ;;  %v474_v28 = vpop.f32.mrb[3].mxu0  ;;  %617 = vst [vmem:[%s1496_s12 + $0x98] sm:$0xff] %v1543_v29  ;;  %v1548_v33 = vpop.f32.mrb[3].mxu1  ;;  %v674_v37 = vmul.f32 %v976_v26, %v976_v26 }
 0x14b   : > { %599 = vst [vmem:[%s1496_s12 + $0x8] sm:$0xff] %v474_v28  ;;  %v631_v31 = vadd.f32 %v474_v28, %v471_v24  ;;  %v672_v32 = vmul.f32 %v474_v28, %v474_v28  ;;  %615 = vst [vmem:[%s1496_s12 + $0x88] sm:$0xff] %v1548_v33 }
 0x14d   : > { %v632_v35 = vadd.f32 %v975_v23, %v631_v31  ;;  %v703_v36 = vadd.f32 %v672_v32, %v671_v30 }
 0x14f   : > { %v704_v38 = vadd.f32 %v703_v36, %v673_v34  ;;  %v979_v39 = vpop.f32.mrb[4].mxu0  ;;  %v633_v40 = vadd.f32 %v976_v26, %v632_v35  ;;  %v1553_v42 = vpop.f32.mrb[4].mxu1 }
 0x150   : > { %604 = vst [vmem:[%s1496_s12 + $0x30] sm:$0xff] %v979_v39  ;;  %v487_v41 = vpop.f32.mrb[5].mxu0  ;;  %620 = vst [vmem:[%s1496_s12 + $0xb0] sm:$0xff] %v1553_v42  ;;  %v1558_v47 = vpop.f32.mrb[5].mxu1  ;;  %v677_v54 = vmul.f32 %v979_v39, %v979_v39 }
 0x151   : > { %602 = vst [vmem:[%s1496_s12 + $0x20] sm:$0xff] %v487_v41  ;;  %v634_v43 = vadd.f32 %v633_v40, %v487_v41  ;;  %v675_v44 = vmul.f32 %v487_v41, %v487_v41  ;;  %v705_v45 = vadd.f32 %v704_v38, %v674_v37  ;;  %v980_v46 = vpop.f32.mrb[6].mxu0  ;;  %618 = vst [vmem:[%s1496_s12 + $0xa0] sm:$0xff] %v1558_v47  ;;  %v1563_v49 = vpop.f32.mrb[6].mxu1 }
 0x152   : > { %605 = vst [vmem:[%s1496_s12 + $0x38] sm:$0xff] %v980_v46  ;;  %v490_v48 = vpop.f32.mrb[7].mxu0  ;;  %621 = vst [vmem:[%s1496_s12 + $0xb8] sm:$0xff] %v1563_v49  ;;  %v1568_v53 = vpop.f32.mrb[7].mxu1  ;;  %v678_v57 = vmul.f32 %v980_v46, %v980_v46 }
 0x153   : > { %v706_v50 = vadd.f32 %v705_v45, %v675_v44  ;;  %603 = vst [vmem:[%s1496_s12 + $0x28] sm:$0xff] %v490_v48  ;;  %v635_v51 = vadd.f32 %v634_v43, %v490_v48  ;;  %v676_v52 = vmul.f32 %v490_v48, %v490_v48  ;;  %619 = vst [vmem:[%s1496_s12 + $0xa8] sm:$0xff] %v1568_v53 }
 0x155   : > { %v636_v55 = vadd.f32 %v979_v39, %v635_v51  ;;  %v707_v56 = vadd.f32 %v706_v50, %v676_v52 }
 0x157   : > { %v708_v58 = vadd.f32 %v707_v56, %v677_v54  ;;  %v983_v59 = vpop.f32.mrb[8].mxu0  ;;  %v637_v60 = vadd.f32 %v980_v46, %v636_v55  ;;  %v1573_v62 = vpop.f32.mrb[8].mxu1 }
 0x158   : > { %608 = vst [vmem:[%s1496_s12 + $0x50] sm:$0xff] %v983_v59  ;;  %v503_v61 = vpop.f32.mrb[9].mxu0  ;;  %624 = vst [vmem:[%s1496_s12 + $0xd0] sm:$0xff] %v1573_v62  ;;  %v1578_v3 = vpop.f32.mrb[9].mxu1  ;;  %v681_v10 = vmul.f32 %v983_v59, %v983_v59 }
 0x159   : > { %606 = vst [vmem:[%s1496_s12 + $0x40] sm:$0xff] %v503_v61  ;;  %v638_v63 = vadd.f32 %v637_v60, %v503_v61  ;;  %v679_v0 = vmul.f32 %v503_v61, %v503_v61  ;;  %v709_v1 = vadd.f32 %v708_v58, %v678_v57  ;;  %v984_v2 = vpop.f32.mrb[10].mxu0  ;;  %622 = vst [vmem:[%s1496_s12 + $0xc0] sm:$0xff] %v1578_v3  ;;  %v1583_v5 = vpop.f32.mrb[10].mxu1 }
 0x15a   : > { %609 = vst [vmem:[%s1496_s12 + $0x58] sm:$0xff] %v984_v2  ;;  %v506_v4 = vpop.f32.mrb[11].mxu0  ;;  %625 = vst [vmem:[%s1496_s12 + $0xd8] sm:$0xff] %v1583_v5  ;;  %v1588_v9 = vpop.f32.mrb[11].mxu1  ;;  %v682_v13 = vmul.f32 %v984_v2, %v984_v2 }
 0x15b   : > { %v710_v6 = vadd.f32 %v709_v1, %v679_v0  ;;  %607 = vst [vmem:[%s1496_s12 + $0x48] sm:$0xff] %v506_v4  ;;  %v639_v7 = vadd.f32 %v638_v63, %v506_v4  ;;  %v680_v8 = vmul.f32 %v506_v4, %v506_v4  ;;  %623 = vst [vmem:[%s1496_s12 + $0xc8] sm:$0xff] %v1588_v9 }
 0x15d   : > { %v640_v11 = vadd.f32 %v983_v59, %v639_v7  ;;  %v711_v12 = vadd.f32 %v710_v6, %v680_v8 }
 0x15f   : > { %v712_v14 = vadd.f32 %v711_v12, %v681_v10  ;;  %v987_v15 = vpop.f32.mrb[12].mxu0  ;;  %v641_v16 = vadd.f32 %v984_v2, %v640_v11  ;;  %v1595_v18 = vpop.f32.mrb[12].mxu1 }
 0x160   : > { %612 = vst [vmem:[%s1496_s12 + $0x70] sm:$0xff] %v987_v15  ;;  %v519_v17 = vpop.f32.mrb[13].mxu0  ;;  %628 = vst [vmem:[%s1496_s12 + $0xf0] sm:$0xff] %v1595_v18  ;;  %v1600_v23 = vpop.f32.mrb[13].mxu1  ;;  %v685_v34 = vmul.f32 %v987_v15, %v987_v15 }
 0x161   : > { %610 = vst [vmem:[%s1496_s12 + $0x60] sm:$0xff] %v519_v17  ;;  %v642_v19 = vadd.f32 %v641_v16, %v519_v17  ;;  %v683_v20 = vmul.f32 %v519_v17, %v519_v17  ;;  %v713_v21 = vadd.f32 %v712_v14, %v682_v13  ;;  %v988_v22 = vpop.f32.mrb[14].mxu0  ;;  %626 = vst [vmem:[%s1496_s12 + $0xe0] sm:$0xff] %v1600_v23  ;;  %v1612_v26 = vpop.f32.mrb[14].mxu1 }
 0x162   : > { %613 = vst [vmem:[%s1496_s12 + $0x78] sm:$0xff] %v988_v22  ;;  %v522_v24 = vpop.f32.mrb[15].mxu0  ;;  %629 = vst [vmem:[%s1496_s12 + $0xf8] sm:$0xff] %v1612_v26  ;;  %v1617_v32 = vpop.f32.mrb[15].mxu1 }
 0x163   : > { %v714_v28 = vadd.f32 %v713_v21, %v683_v20  ;;  %611 = vst [vmem:[%s1496_s12 + $0x68] sm:$0xff] %v522_v24  ;;  %v643_v30 = vadd.f32 %v642_v19, %v522_v24  ;;  %v684_v31 = vmul.f32 %v522_v24, %v522_v24  ;;  %627 = vst [vmem:[%s1496_s12 + $0xe8] sm:$0xff] %v1617_v32 }
 0x165   : > { %v644_v35 = vadd.f32 %v987_v15, %v643_v30  ;;  %v715_v36 = vadd.f32 %v714_v28, %v684_v31 }
 0x166   : > { %1185 = shalt.err (!%p1182_p10)
}
 0x167   : > { %s1186_s14 = scalar_lea.hbm %s1605_s29, 4096  ;;  %s1190_s6 = scalar_lea.hbm %s1761_s2, 8192 }
 0x168   : > { %p1187_p1 = scmp.ne.s32.totalorder %s1605_s29, %s1186_s14  ;;  %p1191_p12 = scmp.lt.u32.totalorder %s1605_s29, %s1761_s2 }
 0x169   : > { %p1192_p2 = scmp.lt.u32.totalorder %s1190_s6, %s1186_s14  ;;  %p1194_p6 = scmp.lt.u32.totalorder %s1186_s14, %s1605_s29 }
 0x16a   : > { %p1188_p0 = pnand %p1187_p1, %p1430_p11 }
 0x16b   : > { %p1193_p4 = por %p1192_p2, %p1191_p12 }
 0x16c   : > { %p1189_p5 = pneg %p1188_p0 }
 0x16d   : > { %p1195_p8 = por %p1194_p6, %p1193_p4 }
 0x16f   : > { %p1196_p9 = pnand %p1195_p8, %p1189_p5 }
 0x171   : > { %1199 = shalt.err (!%p1196_p9)
}
 0x172   : > { %s1306_s21 = smov 128   ;;  %s1307_s9 = smov 8   ;;  %v686_v37 = vmul.f32 %v988_v22, %v988_v22  ;;  %v716_v38 = vadd.f32 %v715_v36, %v685_v34  ;;  %v645_v39 = vadd.f32 %v988_v22, %v644_v35  ;;  %v687_v40 = vmul.f32 %v1538_v27, %v1538_v27  ;;  %v630_v36 = vld [vmem:[#allocation8] sm:$0x1] }
 0x173   : > { %1023 = dma.vmem_to_hbm [thread:$0]  (%p1430_p11), %s1607_s13, 4096, %s1605_s29, %s743_s10, %s1306_s21, %s1306_s21, %s1307_s9   ;;  %v688_v46 = vmul.f32 %v1548_v33, %v1548_v33  ;;  %v689_v48 = vmul.f32 %v1533_v25, %v1533_v25  ;;  %v690_v52 = vmul.f32 %v1543_v29, %v1543_v29  ;;  %v692_v59 = vmul.f32 %v1568_v53, %v1568_v53 }
 0x174   : > { %v646_v41 = vadd.f32 %v645_v39, %v1538_v27  ;;  %v717_v43 = vadd.f32 %v716_v38, %v686_v37  ;;  %v691_v27 = vmul.f32 %v1558_v47, %v1558_v47  ;;  %v696_v6 = vmul.f32 %v1588_v9, %v1588_v9  ;;  %s1308_s30 = smov [#allocation8]   ;;  %v670_v38 = vld [vmem:[#allocation10] sm:$0x1]  ;;  %s1309_s13 = smov [#allocation10]  }
 0x175   : > { %v700_v15 = vmul.f32 %v1617_v32, %v1617_v32  ;;  %s770_s11 = sshll.u32 %s1308_s30, 4  ;;  %s781_s28 = sshll.u32 %s1309_s13, 4  ;;  %s771_s11 = int_to_ptr.vmem [resolvable:$true] %s770_s11  ;;  %s1693_s28 = int_to_ptr.vmem [resolvable:$true] %s781_s28 }
 0x176   : > { %v718_v44 = vadd.f32 %v717_v43, %v687_v40  ;;  %v647_v45 = vadd.f32 %v646_v41, %v1548_v33  ;;  %s1200_s29 = scalar_lea.vmem %s771_s11, 16  ;;  %p1779_p13 = scmp.eq.s32.totalorder %s1356_s19, 1 }
 0x177   : > { %p1201_p11 = scmp.ne.s32.totalorder %s771_s11, %s1200_s29  ;;  %s1206_s10 = scalar_lea.vmem %s771_s11, 32 }
 0x178   : > { %v648_v50 = vadd.f32 %v1533_v25, %v647_v45  ;;  %v719_v51 = vadd.f32 %v718_v44, %v688_v46  ;;  %v693_v25 = vmul.f32 %v1553_v42, %v1553_v42  ;;  %p1207_p10 = scmp.lt.s32.totalorder %s771_s11, %s771_s11  ;;  %p1208_p1 = scmp.lt.s32.totalorder %s1206_s10, %s1200_s29 }
 0x179   : > { %p1202_p3 = pnand %p1201_p11, %p1779_p13 }
 0x17a   : > { %v720_v54 = vadd.f32 %v719_v51, %v689_v48  ;;  %v649_v55 = vadd.f32 %v1543_v29, %v648_v50  ;;  %v694_v29 = vmul.f32 %v1563_v49, %v1563_v49  ;;  %p1209_p0 = por %p1208_p1, %p1207_p10 }
 0x17b   : > { %p1203_p7 = pneg %p1202_p3 }
 0x17c   : > { %v650_v56 = vadd.f32 %v649_v55, %v1558_v47  ;;  %v721_v57 = vadd.f32 %v720_v54, %v690_v52  ;;  %v695_v47 = vmul.f32 %v1578_v3, %v1578_v3 }
 0x17d   : > { %p1210_p5 = pnand %p1209_p0, %p1203_p7 }
 0x17e   : > { %v722_v58 = vadd.f32 %v721_v57, %v691_v27  ;;  %v651_v33 = vadd.f32 %v650_v56, %v1568_v53 }
 0x180   : > { %v652_v60 = vadd.f32 %v1553_v42, %v651_v33  ;;  %v723_v61 = vadd.f32 %v722_v58, %v692_v59  ;;  %v697_v42 = vmul.f32 %v1573_v62, %v1573_v62 }
 0x182   : > { %v724_v63 = vadd.f32 %v723_v61, %v693_v25  ;;  %v653_v0 = vadd.f32 %v1563_v49, %v652_v60  ;;  %v698_v49 = vmul.f32 %v1583_v5, %v1583_v5 }
 0x184   : > { %v654_v1 = vadd.f32 %v653_v0, %v1578_v3  ;;  %v725_v2 = vadd.f32 %v724_v63, %v694_v29  ;;  %v699_v3 = vmul.f32 %v1600_v23, %v1600_v23 }
 0x186   : > { %v726_v4 = vadd.f32 %v725_v2, %v695_v47  ;;  %v655_v53 = vadd.f32 %v654_v1, %v1588_v9 }
 0x188   : > { %v656_v7 = vadd.f32 %v1573_v62, %v655_v53  ;;  %v727_v8 = vadd.f32 %v726_v4, %v696_v6  ;;  %v701_v62 = vmul.f32 %v1595_v18, %v1595_v18 }
 0x18a   : > { %v728_v10 = vadd.f32 %v727_v8, %v697_v42  ;;  %v657_v11 = vadd.f32 %v1583_v5, %v656_v7  ;;  %v702_v5 = vmul.f32 %v1612_v26, %v1612_v26 }
 0x18c   : > { %v658_v12 = vadd.f32 %v657_v11, %v1600_v23  ;;  %v729_v13 = vadd.f32 %v728_v10, %v698_v49 }
 0x18e   : > { %v730_v14 = vadd.f32 %v729_v13, %v699_v3  ;;  %v659_v9 = vadd.f32 %v658_v12, %v1617_v32 }
 0x190   : > { %v660_v16 = vadd.f32 %v1595_v18, %v659_v9  ;;  %v731_v17 = vadd.f32 %v730_v14, %v700_v15 }
 0x192   : > { %v661_v19 = vadd.f32 %v1612_v26, %v660_v16  ;;  %v732_v20 = vadd.f32 %v731_v17, %v701_v62 }
 0x194   : > { %v662_v21 = vrot.slane %v661_v19, 4  ;;  %v733_v22 = vadd.f32 %v732_v20, %v702_v5 }
 0x196   : > { %v663_v23 = vadd.f32 %v662_v21, %v661_v19  ;;  %v734_v24 = vrot.slane %v733_v22, 4 }
 0x198   : > { %v664_v28 = vrot.slane %v663_v23, 2  ;;  %v735_v30 = vadd.f32 %v734_v24, %v733_v22 }
 0x19a   : > { %v665_v31 = vadd.f32 %v664_v28, %v663_v23  ;;  %v736_v32 = vrot.slane %v735_v30, 2 }
 0x19c   : > { %v666_v34 = vrot.slane %v665_v31, 1  ;;  %v737_v35 = vadd.f32 %v736_v32, %v735_v30 }
 0x19e   : > { %v667_v18 = vadd.f32 %v666_v34, %v665_v31  ;;  %v738_v37 = vrot.slane %v737_v35, 1 }
 0x1a0   : > { %v668_v26 = vadd.f32 %v667_v18, %v630_v36  ;;  %v739_v39 = vadd.f32 %v738_v37, %v737_v35 }
 0x1a2   : > { %669 = vst [vmem:[#allocation8] sm:$0x1] %v668_v26  ;;  %v740_v40 = vadd.f32 %v739_v39, %v670_v38 }
 0x1a3   : > { %1213 = shalt.err (!%p1210_p5)
}
 0x1a4   : > { %s1214_s8 = scalar_lea.hbm %s1762_s3, 16  ;;  %p1780_p2 = pmov %p1779_p13 }
 0x1a5   : > { %p1215_p12 = scmp.ne.s32.totalorder %s1762_s3, %s1214_s8  ;;  %p1220_p8 = scmp.lt.u32.totalorder %s1214_s8, %s1762_s3 }
 0x1a7   : > { %p1216_p4 = pnand %p1215_p12, %p1780_p2 }
 0x1a9   : > { %p1217_p6 = pneg %p1216_p4 }
 0x1ab   : > { %p1222_p9 = pnand %p1220_p8, %p1217_p6 }
 0x1ad   : > { %1225 = shalt.err (!%p1222_p9)
}
 0x1ae   : > { %p1781_p11 = pmov %p1780_p2  ;;  %741 = vst [vmem:[#allocation10] sm:$0x1] %v740_v40  ;;  %s1226_s12 = scalar_lea.vmem %s1693_s28, 16 }
 0x1af   : > { %p1227_p13 = scmp.ne.s32.totalorder %s1693_s28, %s1226_s12  ;;  %p1782_p3 = pmov %p1780_p2 }
 0x1b0   : > { %1025 = dma.vmem_to_hbm [thread:$0]  (%p1781_p11), %s771_s11, 16, %s1762_s3, [#allocation9]  }
 0x1b1   : > { %p1228_p7 = pnand %p1227_p13, %p1782_p3  ;;  %s1232_s21 = scalar_lea.vmem %s1693_s28, 32 }
 0x1b2   : > { %p1233_p1 = scmp.lt.s32.totalorder %s1693_s28, %s1693_s28  ;;  %p1234_p0 = scmp.lt.s32.totalorder %s1232_s21, %s1226_s12 }
 0x1b3   : > { %p1229_p10 = pneg %p1228_p7 }
 0x1b4   : > { %p1235_p5 = por %p1234_p0, %p1233_p1 }
 0x1b6   : > { %p1236_p12 = pnand %p1235_p5, %p1229_p10 }
 0x1b8   : > { %1239 = shalt.err (!%p1236_p12)
}
 0x1b9   : > { %s1240_s13 = scalar_lea.hbm %s1763_s4, 16  ;;  %p1783_p4 = pmov %p1782_p3 }
 0x1ba   : > { %p1241_p2 = scmp.ne.s32.totalorder %s1763_s4, %s1240_s13  ;;  %p1246_p9 = scmp.lt.u32.totalorder %s1240_s13, %s1763_s4 }
 0x1bc   : > { %p1242_p6 = pnand %p1241_p2, %p1783_p4 }
 0x1be   : > { %p1243_p8 = pneg %p1242_p6 }
 0x1c0   : > { %p1248_p11 = pnand %p1246_p9, %p1243_p8 }
 0x1c2   : > { %1251 = shalt.err (!%p1248_p11)
}
 0x1c3   : > { %p1784_p13 = pmov %p1782_p3 }
 0x1c5   : > { %1027 = dma.vmem_to_hbm [thread:$0]  (%p1784_p13), %s1693_s28, 16, %s1763_s4, [#allocation9]  }
 0x1c6   : > { %1277 = dma.done.wait (%p1782_p3), [#allocation9], 32   ;;  %p1785_p7 = pmov %p1782_p3 }
 0x1c8   : > { %1279 = vsyncadd (%p1785_p7), [#allocation9], 4294967264 }
 0x1c9 PF: > { %s801_s25 = sand.u32 1, %s1286_s15   ;;  %p1786_p10 = scmp.ne.s32.totalorder %s1768_s22, 0 }
 0x1ca   : > { %p1787_p1 = scmp.ge.s32.totalorder %s1298_s18, 2  ;;  %s802_s14 = scalar_lea.sflag [#allocation4], %s801_s25 }
 0x1cc   : > { %p1042_p0 = pnand %p1787_p1, %p1786_p10 }
 0x1ce   : > { %1281 = dma.done.wait (!%p1042_p0), %s802_s14, 4096  }
 0x1cf   : > { %1283 = vsyncadd (!%p1042_p0), %s802_s14, 4294963200  ;;  %p20_p5 = scmp.ge.s32.totalorder %s1392_s27, 4   ;;  %s1788_s15 = smov %s1290_s16 }
 0x1d0   : > { %s1789_s16 = smov %s1294_s17  ;;  %s1790_s17 = smov %s1426_s24 }
 0x1d1   : > { %s1791_s18 = smov %s1392_s27  ;;  %22 = sbr.rel (!%p20_p5) target bundleno = 7 (0x7), region = 97 }
 0x1d8   :  { %807 = vsyncpa [#allocation3], 1 }
 0x1d9   :  { %809 = vsyncpa [#allocation3 + $0x1], 1 }
 0x1da   :  { %810 = vsyncpa [#allocation6], 1 }
 0x1db   :  { %811 = vsyncpa [#allocation4], 1 }
 0x1dc   :  { %813 = vsyncpa [#allocation4 + $0x1], 1 }
 0x1dd   :  { %814 = vsyncpa [#allocation9], 1 }

</bundles_post_ra>
